<compile_context>
chip_gen: v7x
topology: tpu7x:2x2x1
jax: 0.10.0
libtpu: 0.0.40
codegen_flags: <defaults>
</compile_context>

<pallas_src>
import functools

import jax
import jax.numpy as jnp
from jax.experimental import pallas as pl
from jax.experimental.pallas import tpu as pltpu

EPS = 0.0  # GINConv default: eps=0.0, train_eps=False


def _round_up(a, b):
    return ((a + b - 1) // b) * b


# ----------------------------------------------------------------------------- kernel
def _gin_conv_kernel(mask_ref, adj_ref, x_ref,
                     wa_ref, ba_ref, wb_ref, bb_ref,
                     out_ref, acc_ref, *, apply_outer_relu):
    i = pl.program_id(0)   # destination-node tile
    k = pl.program_id(1)   # source-node tile (reduction axis, last)

    @pl.when(k == 0)
    def _init():
        acc_ref[...] = jnp.zeros_like(acc_ref)

    # Block-sparse skip: only run the MXU pass if this adj tile has any nonzeros.
    @pl.when(mask_ref[i, k] != 0)
    def _accumulate():
        adj = adj_ref[...].astype(jnp.float32)   # bf16 -> f32 (exact: integer counts)
        acc_ref[...] += jnp.dot(adj, x_ref[...],
                                preferred_element_type=jnp.float32)

    @pl.when(k == pl.num_programs(1) - 1)
    def _finalize():
        z = acc_ref[...]                                            # (1+eps)*x + sum_nbrs x
        h = jnp.dot(z, wa_ref[...], preferred_element_type=jnp.float32) + ba_ref[...]
        h = jnp.maximum(h, 0.0)                                     # ReLU inside the MLP
        h = jnp.dot(h, wb_ref[...], preferred_element_type=jnp.float32) + bb_ref[...]
        if apply_outer_relu:                                        # F.relu between convs
            h = jnp.maximum(h, 0.0)
        out_ref[...] = h.astype(out_ref.dtype)


# ----------------------------------------------------------------------- one GINConv
def _gin_conv(adj_eff_bf16, block_mask, x, wa, ba, wb, bb, *,
              node_tile, apply_outer_relu):
    n_pad, c_in = x.shape
    c_out = wa.shape[1]
    nt = n_pad // node_tile

    kernel = functools.partial(_gin_conv_kernel, apply_outer_relu=apply_outer_relu)

    flops = 2 * n_pad * n_pad * c_in + 2 * n_pad * c_in * c_out + 2 * n_pad * c_out * c_out
    bytes_accessed = (n_pad * n_pad * 2                       # bf16 adjacency stream
                      + n_pad * c_in * 4 + n_pad * c_out * 4  # x in, h out
                      + (c_in * c_out + c_out * c_out + 2 * c_out) * 4)

    grid_spec = pltpu.PrefetchScalarGridSpec(
        num_scalar_prefetch=1,          # block_mask -> SMEM, passed to index_maps
        grid=(nt, nt),
        in_specs=[
            pl.BlockSpec((node_tile, node_tile), lambda i, k, m: (i, k)),  # adj tile
            pl.BlockSpec((node_tile, c_in),      lambda i, k, m: (k, 0)),  # x src tile
            # weights/biases: constant index_map -> fetched once, VMEM resident
            pl.BlockSpec((c_in, c_out),          lambda i, k, m: (0, 0)),
            pl.BlockSpec((1, c_out),             lambda i, k, m: (0, 0)),
            pl.BlockSpec((c_out, c_out),         lambda i, k, m: (0, 0)),
            pl.BlockSpec((1, c_out),             lambda i, k, m: (0, 0)),
        ],
        out_specs=pl.BlockSpec((node_tile, c_out), lambda i, k, m: (i, 0)),
        scratch_shapes=[pltpu.VMEM((node_tile, c_out), jnp.float32)],     # f32 accumulator
    )

    return pl.pallas_call(
        kernel,
        out_shape=jax.ShapeDtypeStruct((n_pad, c_out), jnp.float32),
        grid_spec=grid_spec,
        compiler_params=pltpu.CompilerParams(
            dimension_semantics=("parallel", "arbitrary")),
        cost_estimate=pl.CostEstimate(flops=flops, transcendentals=0,
                                      bytes_accessed=bytes_accessed),
    )(block_mask, adj_eff_bf16, x, wa, ba, wb, bb)


# --------------------------------------------------------------------------- GINBlock
@functools.partial(jax.jit, static_argnames=("node_tile", "lane"))
def gin_block_pallas(x, edge_index, params, *, node_tile=256, lane=128):
    """x: [N, C_in] f32, edge_index: [2, E] int32 (row0=src, row1=dst), params: MLP weights."""
    n_nodes, c_in = x.shape
    hidden = params["w11"].shape[1]

    n_pad = _round_up(max(n_nodes, node_tile), node_tile)   # 256-aligned node axis
    c_pad = _round_up(c_in, lane)                           # lane-dense channels
    h_pad = _round_up(hidden, lane)

    # Glue: dense effective adjacency adj + (1+eps)*I, stored bf16 (integer counts -> exact).
    src, dst = edge_index[0], edge_index[1]
    adj = jnp.zeros((n_pad, n_pad), jnp.float32).at[dst, src].add(1.0)
    adj_eff = adj + (1.0 + EPS) * jnp.eye(n_pad, dtype=jnp.float32)
    adj_eff_bf16 = adj_eff.astype(jnp.bfloat16)

    # Per-tile nonzero mask (scalar prefetch) for block-sparse skip of empty adj tiles.
    nt = n_pad // node_tile
    block_mask = (adj_eff.reshape(nt, node_tile, nt, node_tile)
                  .sum(axis=(1, 3)) != 0).astype(jnp.int32)

    # Zero-pad features and parameters (exactly preserves the unpadded math).
    x_p = jnp.zeros((n_pad, c_pad), jnp.float32).at[:n_nodes, :c_in].set(x)

    def pad2(w, rows, cols):
        return jnp.zeros((rows, cols), jnp.float32).at[:w.shape[0], :w.shape[1]].set(w)

    w11 = pad2(params["w11"], c_pad, h_pad); b11 = pad2(params["b11"], 1, h_pad)
    w12 = pad2(params["w12"], h_pad, h_pad); b12 = pad2(params["b12"], 1, h_pad)
    w21 = pad2(params["w21"], h_pad, h_pad); b21 = pad2(params["b21"], 1, h_pad)
    w22 = pad2(params["w22"], h_pad, h_pad); b22 = pad2(params["b22"], 1, h_pad)

    # conv1 (+ fused outer ReLU), then conv2.  Two passes: conv2 needs h of ALL src nodes.
    h = _gin_conv(adj_eff_bf16, block_mask, x_p, w11, b11, w12, b12,
                  node_tile=node_tile, apply_outer_relu=True)
    out = _gin_conv(adj_eff_bf16, block_mask, h, w21, b21, w22, b22,
                    node_tile=node_tile, apply_outer_relu=False)
    return out[:n_nodes, :hidden]


# --------------------------------------------------------------------------- reference
def gin_block_reference(x, edge_index, params):
    """Pure-JAX reference of the same forward (for the correctness check)."""
    n_nodes = x.shape[0]
    src, dst = edge_index[0], edge_index[1]
    adj = jnp.zeros((n_nodes, n_nodes), jnp.float32).at[dst, src].add(1.0)

    def conv(h, w_a, b_a, w_b, b_b):
        agg = adj @ h
        z = (1.0 + EPS) * h + agg
        z = jnp.maximum(z @ w_a + b_a, 0.0)
        return z @ w_b + b_b

    h = conv(x, params["w11"], params["b11"], params["w12"], params["b12"])
    h = jnp.maximum(h, 0.0)
    return conv(h, params["w21"], params["b21"], params["w22"], params["b22"])


def init_params(key, in_channels, out_channels):
    """Deterministic Linear-style init: U(-1/sqrt(fan_in), 1/sqrt(fan_in))."""
    def linear(k, fan_in, fan_out):
        kw, kb = jax.random.split(k)
        bound = 1.0 / jnp.sqrt(fan_in)
        w = jax.random.uniform(kw, (fan_in, fan_out), jnp.float32, -bound, bound)
        b = jax.random.uniform(kb, (1, fan_out), jnp.float32, -bound, bound)
        return w, b

    k1, k2, k3, k4 = jax.random.split(key, 4)
    w11, b11 = linear(k1, in_channels, out_channels)   # nn1: Linear(in, out)
    w12, b12 = linear(k2, out_channels, out_channels)  # nn1: Linear(out, out)
    w21, b21 = linear(k3, out_channels, out_channels)  # nn2: Linear(out, out)
    w22, b22 = linear(k4, out_channels, out_channels)  # nn2: Linear(out, out)
    return dict(w11=w11, b11=b11, w12=w12, b12=b12,
                w21=w21, b21=b21, w22=w22, b22=b22)


if __name__ == "__main__":
    in_channels, out_channels = 4, 32
    n_nodes, n_edges = 8, 16

    key = jax.random.PRNGKey(0)
    kx, ke, kp = jax.random.split(key, 3)

    x = jax.random.normal(kx, (n_nodes, in_channels), jnp.float32)
    edge_index = jax.random.randint(ke, (2, n_edges), 0, n_nodes, jnp.int32)
    params = init_params(kp, in_channels, out_channels)

    out = gin_block_pallas(x, edge_index, params)
    out = jax.block_until_ready(out)

    ref = gin_block_reference(x, edge_index, params)
    assert out.shape == (n_nodes, out_channels)
    assert jnp.allclose(out, ref, atol=1e-3, rtol=1e-3), "mismatch vs JAX reference"

    print("KERNEL_OK")
</pallas_src>

<mosaic_0001>
module attributes {stable_mosaic.version = 11 : i64} {
  func.func private @main(%arg0: i32) attributes {dimension_semantics = [#tpu.dimension_semantics<core_parallel>], iteration_bounds = array<i64: 2>, tpu.core_type = #tpu.core_type<sc_scalar_subcore>, window_params = []} {
    return
  }
}

module attributes {stable_mosaic.version = 11 : i64} {
  func.func private @main(%arg0: i32) attributes {dimension_semantics = [#tpu.dimension_semantics<core_parallel>], iteration_bounds = array<i64: 2>, tpu.core_type = #tpu.core_type<sc_scalar_subcore>, window_params = []} {
    return
  }
}

module attributes {stable_mosaic.version = 11 : i64} {
  func.func @_gin_conv_kernel(%arg0: i32, %arg1: i32, %arg2: memref<1x1xi32, #tpu.memory_space<smem>>, %arg3: memref<256x256xbf16, #tpu.memory_space<vmem>>, %arg4: memref<256x128xf32, #tpu.memory_space<vmem>>, %arg5: memref<128x128xf32, #tpu.memory_space<vmem>>, %arg6: memref<1x128xf32, #tpu.memory_space<vmem>>, %arg7: memref<128x128xf32, #tpu.memory_space<vmem>>, %arg8: memref<1x128xf32, #tpu.memory_space<vmem>>, %arg9: memref<256x128xf32, #tpu.memory_space<vmem>>, %arg10: memref<256x128xf32, #tpu.memory_space<vmem>>) attributes {dimension_semantics = [#tpu.dimension_semantics<parallel>, #tpu.dimension_semantics<arbitrary>], iteration_bounds = array<i64: 1, 1>, scalar_prefetch = 1 : i64, scratch_operands = 1 : i64, tpu.core_type = #tpu.core_type<tc>, window_params = [{transform_indices = @transform_0, window_bounds = array<i64: 256, 256>}, {transform_indices = @transform_1, window_bounds = array<i64: 256, 128>}, {pipeline_mode = #tpu.pipeline_mode<synchronous>, transform_indices = @transform_2, window_bounds = array<i64: 128, 128>}, {pipeline_mode = #tpu.pipeline_mode<synchronous>, transform_indices = @transform_3, window_bounds = array<i64: 1, 128>}, {pipeline_mode = #tpu.pipeline_mode<synchronous>, transform_indices = @transform_4, window_bounds = array<i64: 128, 128>}, {pipeline_mode = #tpu.pipeline_mode<synchronous>, transform_indices = @transform_5, window_bounds = array<i64: 1, 128>}, {transform_indices = @transform_6, window_bounds = array<i64: 256, 128>}]} {
    %c0_i32 = arith.constant 0 : i32
    %0 = arith.cmpi eq, %arg1, %c0_i32 : i32
    %1 = arith.extui %0 : i1 to i32
    %c0_i32_0 = arith.constant 0 : i32
    %2 = arith.cmpi ne, %1, %c0_i32_0 : i32
    scf.if %2 {
      %cst = arith.constant 0.000000e+00 : f32
      %12 = vector.broadcast %cst : f32 to vector<256x128xf32>
      %c0 = arith.constant 0 : index
      %c0_5 = arith.constant 0 : index
      %13 = vector.load %arg10[%c0, %c0_5] : memref<256x128xf32, #tpu.memory_space<vmem>>, vector<256x128xf32>
      tpu.vector_store %arg10[%c0, %c0_5], %12 {strides = array<i32>} : memref<256x128xf32, #tpu.memory_space<vmem>>, vector<256x128xf32>,
    } else {
    }
    %3 = arith.index_cast %arg0 : i32 to index
    %4 = arith.index_cast %arg1 : i32 to index
    %5 = memref.load %arg2[%3, %4] : memref<1x1xi32, #tpu.memory_space<smem>>
    %c0_i32_1 = arith.constant 0 : i32
    %6 = arith.cmpi ne, %5, %c0_i32_1 : i32
    %7 = arith.extui %6 : i1 to i32
    %c0_i32_2 = arith.constant 0 : i32
    %8 = arith.cmpi ne, %7, %c0_i32_2 : i32
    scf.if %8 {
      %c0 = arith.constant 0 : index
      %c0_5 = arith.constant 0 : index
      %12 = vector.load %arg3[%c0, %c0_5] : memref<256x256xbf16, #tpu.memory_space<vmem>>, vector<256x256xbf16>
      %13 = arith.extf %12 : vector<256x256xbf16> to vector<256x256xf32>
      %c0_6 = arith.constant 0 : index
      %c0_7 = arith.constant 0 : index
      %14 = vector.load %arg10[%c0_6, %c0_7] : memref<256x128xf32, #tpu.memory_space<vmem>>, vector<256x128xf32>
      %c0_8 = arith.constant 0 : index
      %c0_9 = arith.constant 0 : index
      %15 = vector.load %arg4[%c0_8, %c0_9] : memref<256x128xf32, #tpu.memory_space<vmem>>, vector<256x128xf32>
      %cst = arith.constant dense<0.000000e+00> : vector<256x128xf32>
      %16 = tpu.matmul %13, %15, %cst {dimension_numbers = #tpu.dot_dimension_numbers<[1], [0], [0], [1], [0, 0, 1, 1], [], []>} : vector<256x256xf32>, vector<256x128xf32>, vector<256x128xf32> -> vector<256x128xf32>
      %17 = arith.addf %14, %16 : vector<256x128xf32>
      %c0_10 = arith.constant 0 : index
      %c0_11 = arith.constant 0 : index
      %18 = vector.load %arg10[%c0_10, %c0_11] : memref<256x128xf32, #tpu.memory_space<vmem>>, vector<256x128xf32>
      tpu.vector_store %arg10[%c0_10, %c0_11], %17 {strides = array<i32>} : memref<256x128xf32, #tpu.memory_space<vmem>>, vector<256x128xf32>,
    } else {
    }
    %c0_i32_3 = arith.constant 0 : i32
    %9 = arith.cmpi eq, %arg1, %c0_i32_3 : i32
    %10 = arith.extui %9 : i1 to i32
    %c0_i32_4 = arith.constant 0 : i32
    %11 = arith.cmpi ne, %10, %c0_i32_4 : i32
    scf.if %11 {
      %c0 = arith.constant 0 : index
      %c0_5 = arith.constant 0 : index
      %12 = vector.load %arg10[%c0, %c0_5] : memref<256x128xf32, #tpu.memory_space<vmem>>, vector<256x128xf32>
      %c0_6 = arith.constant 0 : index
      %c0_7 = arith.constant 0 : index
      %13 = vector.load %arg5[%c0_6, %c0_7] : memref<128x128xf32, #tpu.memory_space<vmem>>, vector<128x128xf32>
      %cst = arith.constant dense<0.000000e+00> : vector<256x128xf32>
      %14 = tpu.matmul %12, %13, %cst {dimension_numbers = #tpu.dot_dimension_numbers<[1], [0], [0], [1], [0, 0, 1, 1], [], []>} : vector<256x128xf32>, vector<128x128xf32>, vector<256x128xf32> -> vector<256x128xf32>
      %c0_8 = arith.constant 0 : index
      %c0_9 = arith.constant 0 : index
      %15 = vector.load %arg6[%c0_8, %c0_9] : memref<1x128xf32, #tpu.memory_space<vmem>>, vector<1x128xf32>
      %16 = vector.broadcast %15 : vector<1x128xf32> to vector<256x128xf32>
      %17 = arith.addf %14, %16 : vector<256x128xf32>
      %cst_10 = arith.constant 0.000000e+00 : f32
      %18 = vector.broadcast %cst_10 : f32 to vector<256x128xf32>
      %19 = arith.maximumf %17, %18 : vector<256x128xf32>
      %c0_11 = arith.constant 0 : index
      %c0_12 = arith.constant 0 : index
      %20 = vector.load %arg7[%c0_11, %c0_12] : memref<128x128xf32, #tpu.memory_space<vmem>>, vector<128x128xf32>
      %cst_13 = arith.constant dense<0.000000e+00> : vector<256x128xf32>
      %21 = tpu.matmul %19, %20, %cst_13 {dimension_numbers = #tpu.dot_dimension_numbers<[1], [0], [0], [1], [0, 0, 1, 1], [], []>} : vector<256x128xf32>, vector<128x128xf32>, vector<256x128xf32> -> vector<256x128xf32>
      %c0_14 = arith.constant 0 : index
      %c0_15 = arith.constant 0 : index
      %22 = vector.load %arg8[%c0_14, %c0_15] : memref<1x128xf32, #tpu.memory_space<vmem>>, vector<1x128xf32>
      %23 = vector.broadcast %22 : vector<1x128xf32> to vector<256x128xf32>
      %24 = arith.addf %21, %23 : vector<256x128xf32>
      %cst_16 = arith.constant 0.000000e+00 : f32
      %25 = vector.broadcast %cst_16 : f32 to vector<256x128xf32>
      %26 = arith.maximumf %24, %25 : vector<256x128xf32>
      %c0_17 = arith.constant 0 : index
      %c0_18 = arith.constant 0 : index
      %27 = vector.load %arg9[%c0_17, %c0_18] : memref<256x128xf32, #tpu.memory_space<vmem>>, vector<256x128xf32>
      tpu.vector_store %arg9[%c0_17, %c0_18], %26 {strides = array<i32>} : memref<256x128xf32, #tpu.memory_space<vmem>>, vector<256x128xf32>,
    } else {
    }
    return
  }
  func.func @transform_0(%arg0: i32, %arg1: i32, %arg2: memref<1x1xi32, #tpu.memory_space<smem>>) -> (i32, i32) {
    %c0_i32 = arith.constant 0 : i32
    return %arg0, %arg1 : i32, i32
  }
  func.func @transform_1(%arg0: i32, %arg1: i32, %arg2: memref<1x1xi32, #tpu.memory_space<smem>>) -> (i32, i32) {
    %c0_i32 = arith.constant 0 : i32
    %c0_i32_0 = arith.constant 0 : i32
    return %arg1, %c0_i32 : i32, i32
  }
  func.func @transform_2(%arg0: i32, %arg1: i32, %arg2: memref<1x1xi32, #tpu.memory_space<smem>>) -> (i32, i32) {
    %c0_i32 = arith.constant 0 : i32
    %c0_i32_0 = arith.constant 0 : i32
    %c0_i32_1 = arith.constant 0 : i32
    return %c0_i32, %c0_i32_0 : i32, i32
  }
  func.func @transform_3(%arg0: i32, %arg1: i32, %arg2: memref<1x1xi32, #tpu.memory_space<smem>>) -> (i32, i32) {
    %c0_i32 = arith.constant 0 : i32
    %c0_i32_0 = arith.constant 0 : i32
    %c0_i32_1 = arith.constant 0 : i32
    return %c0_i32, %c0_i32_0 : i32, i32
  }
  func.func @transform_4(%arg0: i32, %arg1: i32, %arg2: memref<1x1xi32, #tpu.memory_space<smem>>) -> (i32, i32) {
    %c0_i32 = arith.constant 0 : i32
    %c0_i32_0 = arith.constant 0 : i32
    %c0_i32_1 = arith.constant 0 : i32
    return %c0_i32, %c0_i32_0 : i32, i32
  }
  func.func @transform_5(%arg0: i32, %arg1: i32, %arg2: memref<1x1xi32, #tpu.memory_space<smem>>) -> (i32, i32) {
    %c0_i32 = arith.constant 0 : i32
    %c0_i32_0 = arith.constant 0 : i32
    %c0_i32_1 = arith.constant 0 : i32
    return %c0_i32, %c0_i32_0 : i32, i32
  }
  func.func @transform_6(%arg0: i32, %arg1: i32, %arg2: memref<1x1xi32, #tpu.memory_space<smem>>) -> (i32, i32) {
    %c0_i32 = arith.constant 0 : i32
    %c0_i32_0 = arith.constant 0 : i32
    return %arg0, %c0_i32 : i32, i32
  }
}

module attributes {stable_mosaic.version = 11 : i64} {
  func.func @_gin_conv_kernel(%arg0: i32, %arg1: i32, %arg2: memref<1x1xi32, #tpu.memory_space<smem>>, %arg3: memref<256x256xbf16, #tpu.memory_space<vmem>>, %arg4: memref<256x128xf32, #tpu.memory_space<vmem>>, %arg5: memref<128x128xf32, #tpu.memory_space<vmem>>, %arg6: memref<1x128xf32, #tpu.memory_space<vmem>>, %arg7: memref<128x128xf32, #tpu.memory_space<vmem>>, %arg8: memref<1x128xf32, #tpu.memory_space<vmem>>, %arg9: memref<256x128xf32, #tpu.memory_space<vmem>>, %arg10: memref<256x128xf32, #tpu.memory_space<vmem>>) attributes {dimension_semantics = [#tpu.dimension_semantics<parallel>, #tpu.dimension_semantics<arbitrary>], iteration_bounds = array<i64: 1, 1>, scalar_prefetch = 1 : i64, scratch_operands = 1 : i64, tpu.core_type = #tpu.core_type<tc>, window_params = [{transform_indices = @transform_0, window_bounds = array<i64: 256, 256>}, {transform_indices = @transform_1, window_bounds = array<i64: 256, 128>}, {pipeline_mode = #tpu.pipeline_mode<synchronous>, transform_indices = @transform_2, window_bounds = array<i64: 128, 128>}, {pipeline_mode = #tpu.pipeline_mode<synchronous>, transform_indices = @transform_3, window_bounds = array<i64: 1, 128>}, {pipeline_mode = #tpu.pipeline_mode<synchronous>, transform_indices = @transform_4, window_bounds = array<i64: 128, 128>}, {pipeline_mode = #tpu.pipeline_mode<synchronous>, transform_indices = @transform_5, window_bounds = array<i64: 1, 128>}, {transform_indices = @transform_6, window_bounds = array<i64: 256, 128>}]} {
    %c0_i32 = arith.constant 0 : i32
    %0 = arith.cmpi eq, %arg1, %c0_i32 : i32
    %1 = arith.extui %0 : i1 to i32
    %c0_i32_0 = arith.constant 0 : i32
    %2 = arith.cmpi ne, %1, %c0_i32_0 : i32
    scf.if %2 {
      %cst = arith.constant 0.000000e+00 : f32
      %12 = vector.broadcast %cst : f32 to vector<256x128xf32>
      %c0 = arith.constant 0 : index
      %c0_5 = arith.constant 0 : index
      %13 = vector.load %arg10[%c0, %c0_5] : memref<256x128xf32, #tpu.memory_space<vmem>>, vector<256x128xf32>
      tpu.vector_store %arg10[%c0, %c0_5], %12 {strides = array<i32>} : memref<256x128xf32, #tpu.memory_space<vmem>>, vector<256x128xf32>,
    } else {
    }
    %3 = arith.index_cast %arg0 : i32 to index
    %4 = arith.index_cast %arg1 : i32 to index
    %5 = memref.load %arg2[%3, %4] : memref<1x1xi32, #tpu.memory_space<smem>>
    %c0_i32_1 = arith.constant 0 : i32
    %6 = arith.cmpi ne, %5, %c0_i32_1 : i32
    %7 = arith.extui %6 : i1 to i32
    %c0_i32_2 = arith.constant 0 : i32
    %8 = arith.cmpi ne, %7, %c0_i32_2 : i32
    scf.if %8 {
      %c0 = arith.constant 0 : index
      %c0_5 = arith.constant 0 : index
      %12 = vector.load %arg3[%c0, %c0_5] : memref<256x256xbf16, #tpu.memory_space<vmem>>, vector<256x256xbf16>
      %13 = arith.extf %12 : vector<256x256xbf16> to vector<256x256xf32>
      %c0_6 = arith.constant 0 : index
      %c0_7 = arith.constant 0 : index
      %14 = vector.load %arg10[%c0_6, %c0_7] : memref<256x128xf32, #tpu.memory_space<vmem>>, vector<256x128xf32>
      %c0_8 = arith.constant 0 : index
      %c0_9 = arith.constant 0 : index
      %15 = vector.load %arg4[%c0_8, %c0_9] : memref<256x128xf32, #tpu.memory_space<vmem>>, vector<256x128xf32>
      %cst = arith.constant dense<0.000000e+00> : vector<256x128xf32>
      %16 = tpu.matmul %13, %15, %cst {dimension_numbers = #tpu.dot_dimension_numbers<[1], [0], [0], [1], [0, 0, 1, 1], [], []>} : vector<256x256xf32>, vector<256x128xf32>, vector<256x128xf32> -> vector<256x128xf32>
      %17 = arith.addf %14, %16 : vector<256x128xf32>
      %c0_10 = arith.constant 0 : index
      %c0_11 = arith.constant 0 : index
      %18 = vector.load %arg10[%c0_10, %c0_11] : memref<256x128xf32, #tpu.memory_space<vmem>>, vector<256x128xf32>
      tpu.vector_store %arg10[%c0_10, %c0_11], %17 {strides = array<i32>} : memref<256x128xf32, #tpu.memory_space<vmem>>, vector<256x128xf32>,
    } else {
    }
    %c0_i32_3 = arith.constant 0 : i32
    %9 = arith.cmpi eq, %arg1, %c0_i32_3 : i32
    %10 = arith.extui %9 : i1 to i32
    %c0_i32_4 = arith.constant 0 : i32
    %11 = arith.cmpi ne, %10, %c0_i32_4 : i32
    scf.if %11 {
      %c0 = arith.constant 0 : index
      %c0_5 = arith.constant 0 : index
      %12 = vector.load %arg10[%c0, %c0_5] : memref<256x128xf32, #tpu.memory_space<vmem>>, vector<256x128xf32>
      %c0_6 = arith.constant 0 : index
      %c0_7 = arith.constant 0 : index
      %13 = vector.load %arg5[%c0_6, %c0_7] : memref<128x128xf32, #tpu.memory_space<vmem>>, vector<128x128xf32>
      %cst = arith.constant dense<0.000000e+00> : vector<256x128xf32>
      %14 = tpu.matmul %12, %13, %cst {dimension_numbers = #tpu.dot_dimension_numbers<[1], [0], [0], [1], [0, 0, 1, 1], [], []>} : vector<256x128xf32>, vector<128x128xf32>, vector<256x128xf32> -> vector<256x128xf32>
      %c0_8 = arith.constant 0 : index
      %c0_9 = arith.constant 0 : index
      %15 = vector.load %arg6[%c0_8, %c0_9] : memref<1x128xf32, #tpu.memory_space<vmem>>, vector<1x128xf32>
      %16 = vector.broadcast %15 : vector<1x128xf32> to vector<256x128xf32>
      %17 = arith.addf %14, %16 : vector<256x128xf32>
      %cst_10 = arith.constant 0.000000e+00 : f32
      %18 = vector.broadcast %cst_10 : f32 to vector<256x128xf32>
      %19 = arith.maximumf %17, %18 : vector<256x128xf32>
      %c0_11 = arith.constant 0 : index
      %c0_12 = arith.constant 0 : index
      %20 = vector.load %arg7[%c0_11, %c0_12] : memref<128x128xf32, #tpu.memory_space<vmem>>, vector<128x128xf32>
      %cst_13 = arith.constant dense<0.000000e+00> : vector<256x128xf32>
      %21 = tpu.matmul %19, %20, %cst_13 {dimension_numbers = #tpu.dot_dimension_numbers<[1], [0], [0], [1], [0, 0, 1, 1], [], []>} : vector<256x128xf32>, vector<128x128xf32>, vector<256x128xf32> -> vector<256x128xf32>
      %c0_14 = arith.constant 0 : index
      %c0_15 = arith.constant 0 : index
      %22 = vector.load %arg8[%c0_14, %c0_15] : memref<1x128xf32, #tpu.memory_space<vmem>>, vector<1x128xf32>
      %23 = vector.broadcast %22 : vector<1x128xf32> to vector<256x128xf32>
      %24 = arith.addf %21, %23 : vector<256x128xf32>
      %c0_16 = arith.constant 0 : index
      %c0_17 = arith.constant 0 : index
      %25 = vector.load %arg9[%c0_16, %c0_17] : memref<256x128xf32, #tpu.memory_space<vmem>>, vector<256x128xf32>
      tpu.vector_store %arg9[%c0_16, %c0_17], %24 {strides = array<i32>} : memref<256x128xf32, #tpu.memory_space<vmem>>, vector<256x128xf32>,
    } else {
    }
    return
  }
  func.func @transform_0(%arg0: i32, %arg1: i32, %arg2: memref<1x1xi32, #tpu.memory_space<smem>>) -> (i32, i32) {
    %c0_i32 = arith.constant 0 : i32
    return %arg0, %arg1 : i32, i32
  }
  func.func @transform_1(%arg0: i32, %arg1: i32, %arg2: memref<1x1xi32, #tpu.memory_space<smem>>) -> (i32, i32) {
    %c0_i32 = arith.constant 0 : i32
    %c0_i32_0 = arith.constant 0 : i32
    return %arg1, %c0_i32 : i32, i32
  }
  func.func @transform_2(%arg0: i32, %arg1: i32, %arg2: memref<1x1xi32, #tpu.memory_space<smem>>) -> (i32, i32) {
    %c0_i32 = arith.constant 0 : i32
    %c0_i32_0 = arith.constant 0 : i32
    %c0_i32_1 = arith.constant 0 : i32
    return %c0_i32, %c0_i32_0 : i32, i32
  }
  func.func @transform_3(%arg0: i32, %arg1: i32, %arg2: memref<1x1xi32, #tpu.memory_space<smem>>) -> (i32, i32) {
    %c0_i32 = arith.constant 0 : i32
    %c0_i32_0 = arith.constant 0 : i32
    %c0_i32_1 = arith.constant 0 : i32
    return %c0_i32, %c0_i32_0 : i32, i32
  }
  func.func @transform_4(%arg0: i32, %arg1: i32, %arg2: memref<1x1xi32, #tpu.memory_space<smem>>) -> (i32, i32) {
    %c0_i32 = arith.constant 0 : i32
    %c0_i32_0 = arith.constant 0 : i32
    %c0_i32_1 = arith.constant 0 : i32
    return %c0_i32, %c0_i32_0 : i32, i32
  }
  func.func @transform_5(%arg0: i32, %arg1: i32, %arg2: memref<1x1xi32, #tpu.memory_space<smem>>) -> (i32, i32) {
    %c0_i32 = arith.constant 0 : i32
    %c0_i32_0 = arith.constant 0 : i32
    %c0_i32_1 = arith.constant 0 : i32
    return %c0_i32, %c0_i32_0 : i32, i32
  }
  func.func @transform_6(%arg0: i32, %arg1: i32, %arg2: memref<1x1xi32, #tpu.memory_space<smem>>) -> (i32, i32) {
    %c0_i32 = arith.constant 0 : i32
    %c0_i32_0 = arith.constant 0 : i32
    return %arg0, %c0_i32 : i32, i32
  }
}

</mosaic_0001>

<bundles_post_ra>
// kernel: gin_block_pallas.3
= control target key start
LH: loop header
LB: loop body
LE: loop exit
PB: predicated region body
PF: predicated region fallthrough
CT: control target
= control target key end

     0   :  { %v1522_v0 = vmov 0.0   ;;  %s2065_s0 = inlined_call_operand.<no memory space> [shape: s32[1,1], index: 0, kind: input, shape index: {}]   ;;  %s2066_s1 = inlined_call_operand.vmem [shape: bf16[256,256], index: 1, kind: input, shape index: {}]   ;;  %s2067_s2 = inlined_call_operand.vmem [shape: f32[256,128], index: 2, kind: input, shape index: {}]   ;;  %s2068_s3 = inlined_call_operand.vmem [shape: f32[128,128], index: 3, kind: input, shape index: {}]   ;;  %s2069_s4 = inlined_call_operand.vmem [shape: f32[1,128], index: 4, kind: input, shape index: {}]   ;;  %s2070_s5 = inlined_call_operand.vmem [shape: f32[128,128], index: 5, kind: input, shape index: {}]   ;;  %s2071_s6 = inlined_call_operand.vmem [shape: f32[1,128], index: 6, kind: input, shape index: {}]   ;;  %s2072_s7 = inlined_call_operand.vmem [shape: f32[256,128], index: 7, kind: output, shape index: {}]  }
   0x1   :  { %29 = vst [vmem:[#allocation2] sm:$0xff] %v1522_v0  ;;  %30 = vst [vmem:[#allocation2 + $0x8] sm:$0xff] %v1522_v0  ;;  %p1117_p0 = scmp.eq.s32.totalorder %s2065_s0, 0 }
   0x2   :  { %31 = vst [vmem:[#allocation2 + $0x10] sm:$0xff] %v1522_v0  ;;  %32 = vst [vmem:[#allocation2 + $0x18] sm:$0xff] %v1522_v0  ;;  %v197_v1 = vld [vmem:[%s2067_s2] sm:$0xff] (!%p1117_p0)  ;;  %v198_v2 = vld [vmem:[%s2067_s2 + $0x8] sm:$0xff] (!%p1117_p0)  ;;  %v1523_v4 = vmov (!%p1117_p0), 0.0|0.0  }
   0x3   :  { %33 = vst [vmem:[#allocation2 + $0x20] sm:$0xff] %v1522_v0  ;;  %34 = vst [vmem:[#allocation2 + $0x28] sm:$0xff] %v1522_v0  ;;  %v199_v3 = vld [vmem:[%s2067_s2 + $0x10] sm:$0xff] (!%p1117_p0)  ;;  %1376 = vmatprep.subr.bf16.mxu0 (!%p1117_p0), %v1523_v4  ;;  %1488 = vmatprep.subr.bf16.mxu1 (!%p1117_p0), %v1523_v4  ;;  %v1377_v5 = vpack.c.bf16 (!%p1117_p0), %v198_v2, %v197_v1  ;;  %v200_v6 = vld [vmem:[%s2067_s2 + $0x18] sm:$0xff] (!%p1117_p0) }
   0x4   :  { %35 = vst [vmem:[#allocation2 + $0x30] sm:$0xff] %v1522_v0  ;;  %36 = vst [vmem:[#allocation2 + $0x38] sm:$0xff] %v1522_v0  ;;  %v1380_v7 = vpack.c.bf16 (!%p1117_p0), %v200_v6, %v199_v3  ;;  %v201_v8 = vld [vmem:[%s2067_s2 + $0x20] sm:$0xff] (!%p1117_p0)  ;;  %v202_v9 = vld [vmem:[%s2067_s2 + $0x28] sm:$0xff] (!%p1117_p0) }
   0x5   :  { %37 = vst [vmem:[#allocation2 + $0x40] sm:$0xff] %v1522_v0  ;;  %38 = vst [vmem:[#allocation2 + $0x48] sm:$0xff] %v1522_v0  ;;  %1378 = vmatpush1.bf16.msra.mxu0 (!%p1117_p0), %v1377_v5  ;;  %1504 = vmatpush1.bf16.msra.mxu1 (!%p1117_p0), %v1377_v5  ;;  %v1383_v10 = vpack.c.bf16 (!%p1117_p0), %v202_v9, %v201_v8  ;;  %v203_v11 = vld [vmem:[%s2067_s2 + $0x30] sm:$0xff] (!%p1117_p0)  ;;  %v204_v12 = vld [vmem:[%s2067_s2 + $0x38] sm:$0xff] (!%p1117_p0) }
   0x6   :  { %39 = vst [vmem:[#allocation2 + $0x50] sm:$0xff] %v1522_v0  ;;  %40 = vst [vmem:[#allocation2 + $0x58] sm:$0xff] %v1522_v0  ;;  %1379 = vmatprep.subr.bf16.mxu0 (!%p1117_p0), %v1523_v4  ;;  %1489 = vmatprep.subr.bf16.mxu1 (!%p1117_p0), %v1523_v4  ;;  %v1600_v13 = vld [vmem:[%s2066_s1] sm:$0xff] (!%p1117_p0)  ;;  %v1386_v14 = vpack.c.bf16 (!%p1117_p0), %v204_v12, %v203_v11  ;;  %v206_v18 = vld [vmem:[%s2067_s2 + $0x48] sm:$0xff] (!%p1117_p0) }
   0x7   :  { %41 = vst [vmem:[#allocation2 + $0x60] sm:$0xff] %v1522_v0  ;;  %42 = vst [vmem:[#allocation2 + $0x68] sm:$0xff] %v1522_v0  ;;  %v102_v15 = vunpack.c.h.bf16 (!%p1117_p0), %v1600_v13  ;;  %v1606_v16 = vld [vmem:[%s2066_s1 + $0x80] sm:$0xff] (!%p1117_p0)  ;;  %v207_v21 = vld [vmem:[%s2067_s2 + $0x50] sm:$0xff] (!%p1117_p0)  ;;  %v101_v56 = vunpack.c.l.bf16 (!%p1117_p0), %v1600_v13 }
   0x8   :  { %43 = vst [vmem:[#allocation2 + $0x70] sm:$0xff] %v1522_v0  ;;  %44 = vst [vmem:[#allocation2 + $0x78] sm:$0xff] %v1522_v0  ;;  %v205_v17 = vld [vmem:[%s2067_s2 + $0x40] sm:$0xff] (!%p1117_p0)  ;;  %v134_v19 = vunpack.c.h.bf16 (!%p1117_p0), %v1606_v16  ;;  %v208_v22 = vld [vmem:[%s2067_s2 + $0x58] sm:$0xff] (!%p1117_p0)  ;;  %v133_v57 = vunpack.c.l.bf16 (!%p1117_p0), %v1606_v16 }
   0x9   :  { %45 = vst [vmem:[#allocation2 + $0x80] sm:$0xff] %v1522_v0  ;;  %46 = vst [vmem:[#allocation2 + $0x88] sm:$0xff] %v1522_v0  ;;  %1381 = vmatpush1.bf16.msra.mxu0 (!%p1117_p0), %v1380_v7  ;;  %1505 = vmatpush1.bf16.msra.mxu1 (!%p1117_p0), %v1380_v7  ;;  %v1389_v20 = vpack.c.bf16 (!%p1117_p0), %v206_v18, %v205_v17  ;;  %v1392_v23 = vpack.c.bf16 (!%p1117_p0), %v208_v22, %v207_v21  ;;  %v209_v24 = vld [vmem:[%s2067_s2 + $0x60] sm:$0xff] (!%p1117_p0)  ;;  %v210_v25 = vld [vmem:[%s2067_s2 + $0x68] sm:$0xff] (!%p1117_p0) }
   0xa   :  { %47 = vst [vmem:[#allocation2 + $0x90] sm:$0xff] %v1522_v0  ;;  %48 = vst [vmem:[#allocation2 + $0x98] sm:$0xff] %v1522_v0  ;;  %68 = sbr.rel (%p1117_p0) target bundleno = 343 (0x157), region = 33  ;;  %1382 = vmatprep.subr.bf16.mxu0 (!%p1117_p0), %v1523_v4  ;;  %1490 = vmatprep.subr.bf16.mxu1 (!%p1117_p0), %v1523_v4  ;;  %v1395_v26 = vpack.c.bf16 (!%p1117_p0), %v210_v25, %v209_v24  ;;  %v211_v27 = vld [vmem:[%s2067_s2 + $0x70] sm:$0xff] (!%p1117_p0)  ;;  %v212_v28 = vld [vmem:[%s2067_s2 + $0x78] sm:$0xff] (!%p1117_p0) }
   0xb   :  { %49 = vst [vmem:[#allocation2 + $0xa0] sm:$0xff] %v1522_v0  ;;  %50 = vst [vmem:[#allocation2 + $0xa8] sm:$0xff] %v1522_v0  ;;  %293 = vmatprep.mubr.f32.mxu0 (!%p1117_p0), %v102_v15  ;;  %373 = vmatprep.mubr.f32.mxu1 (!%p1117_p0), %v134_v19  ;;  %v1398_v29 = vpack.c.bf16 (!%p1117_p0), %v212_v28, %v211_v27  ;;  %v213_v30 = vld [vmem:[%s2067_s2 + $0x80] sm:$0xff] (!%p1117_p0)  ;;  %v214_v31 = vld [vmem:[%s2067_s2 + $0x88] sm:$0xff] (!%p1117_p0) }
   0xc   :  { %51 = vst [vmem:[#allocation2 + $0xb0] sm:$0xff] %v1522_v0  ;;  %52 = vst [vmem:[#allocation2 + $0xb8] sm:$0xff] %v1522_v0  ;;  %v1401_v32 = vpack.c.bf16 (!%p1117_p0), %v214_v31, %v213_v30  ;;  %v215_v33 = vld [vmem:[%s2067_s2 + $0x90] sm:$0xff] (!%p1117_p0)  ;;  %v216_v34 = vld [vmem:[%s2067_s2 + $0x98] sm:$0xff] (!%p1117_p0) }
   0xd   :  { %53 = vst [vmem:[#allocation2 + $0xc0] sm:$0xff] %v1522_v0  ;;  %54 = vst [vmem:[#allocation2 + $0xc8] sm:$0xff] %v1522_v0  ;;  %1384 = vmatpush1.bf16.msra.mxu0 (!%p1117_p0), %v1383_v10  ;;  %1506 = vmatpush1.bf16.msra.mxu1 (!%p1117_p0), %v1383_v10  ;;  %v1404_v35 = vpack.c.bf16 (!%p1117_p0), %v216_v34, %v215_v33  ;;  %v217_v36 = vld [vmem:[%s2067_s2 + $0xa0] sm:$0xff] (!%p1117_p0)  ;;  %v218_v37 = vld [vmem:[%s2067_s2 + $0xa8] sm:$0xff] (!%p1117_p0) }
   0xe   :  { %55 = vst [vmem:[#allocation2 + $0xd0] sm:$0xff] %v1522_v0  ;;  %56 = vst [vmem:[#allocation2 + $0xd8] sm:$0xff] %v1522_v0  ;;  %1385 = vmatprep.subr.bf16.mxu0 (!%p1117_p0), %v1523_v4  ;;  %1491 = vmatprep.subr.bf16.mxu1 (!%p1117_p0), %v1523_v4  ;;  %v1407_v38 = vpack.c.bf16 (!%p1117_p0), %v218_v37, %v217_v36  ;;  %v219_v39 = vld [vmem:[%s2067_s2 + $0xb0] sm:$0xff] (!%p1117_p0)  ;;  %v220_v40 = vld [vmem:[%s2067_s2 + $0xb8] sm:$0xff] (!%p1117_p0) }
   0xf   :  { %57 = vst [vmem:[#allocation2 + $0xe0] sm:$0xff] %v1522_v0  ;;  %58 = vst [vmem:[#allocation2 + $0xe8] sm:$0xff] %v1522_v0  ;;  %v1410_v41 = vpack.c.bf16 (!%p1117_p0), %v220_v40, %v219_v39  ;;  %v221_v42 = vld [vmem:[%s2067_s2 + $0xc0] sm:$0xff] (!%p1117_p0)  ;;  %v222_v43 = vld [vmem:[%s2067_s2 + $0xc8] sm:$0xff] (!%p1117_p0) }
  0x10   :  { %59 = vst [vmem:[#allocation2 + $0xf0] sm:$0xff] %v1522_v0  ;;  %60 = vst [vmem:[#allocation2 + $0xf8] sm:$0xff] %v1522_v0  ;;  %v1413_v44 = vpack.c.bf16 (!%p1117_p0), %v222_v43, %v221_v42  ;;  %v223_v45 = vld [vmem:[%s2067_s2 + $0xd0] sm:$0xff] (!%p1117_p0)  ;;  %v224_v46 = vld [vmem:[%s2067_s2 + $0xd8] sm:$0xff] (!%p1117_p0) }
  0x11   :  { %1387 = vmatpush1.bf16.msra.mxu0 %v1386_v14  ;;  %1507 = vmatpush1.bf16.msra.mxu1 %v1386_v14  ;;  %v1416_v47 = vpack.c.bf16 %v224_v46, %v223_v45  ;;  %v225_v48 = vld [vmem:[%s2067_s2 + $0xe0] sm:$0xff]  ;;  %v226_v49 = vld [vmem:[%s2067_s2 + $0xe8] sm:$0xff]  ;;  %v227_v51 = vld [vmem:[%s2067_s2 + $0xf0] sm:$0xff] }
  0x12   :  { %1388 = vmatprep.subr.bf16.mxu0 %v1523_v4  ;;  %1492 = vmatprep.subr.bf16.mxu1 %v1523_v4  ;;  %v1419_v50 = vpack.c.bf16 %v226_v49, %v225_v48  ;;  %v228_v52 = vld [vmem:[%s2067_s2 + $0xf8] sm:$0xff]  ;;  %v70_v54 = vld [vmem:[%s2066_s1 + $0x8] sm:$0xff]  ;;  %v71_v60 = vld [vmem:[%s2066_s1 + $0x10] sm:$0xff] }
  0x13   :  { %v1422_v53 = vpack.c.bf16 %v228_v52, %v227_v51  ;;  %v86_v55 = vld [vmem:[%s2066_s1 + $0x88] sm:$0xff]  ;;  %v104_v58 = vunpack.c.h.bf16 %v70_v54  ;;  %v87_v61 = vld [vmem:[%s2066_s1 + $0x90] sm:$0xff]  ;;  %v103_v62 = vunpack.c.l.bf16 %v70_v54  ;;  %v106_v0 = vunpack.c.h.bf16 %v71_v60  ;;  %v72_v2 = vld [vmem:[%s2066_s1 + $0x18] sm:$0xff] }
  0x14   :  { %v136_v59 = vunpack.c.h.bf16 %v86_v55  ;;  %v135_v63 = vunpack.c.l.bf16 %v86_v55  ;;  %v138_v1 = vunpack.c.h.bf16 %v87_v61  ;;  %v88_v3 = vld [vmem:[%s2066_s1 + $0x98] sm:$0xff]  ;;  %v137_v5 = vunpack.c.l.bf16 %v87_v61  ;;  %v73_v8 = vld [vmem:[%s2066_s1 + $0x20] sm:$0xff]  ;;  %v74_v14 = vld [vmem:[%s2066_s1 + $0x28] sm:$0xff] }
  0x15   :  { %1390 = vmatpush1.bf16.msra.mxu0 %v1389_v20  ;;  %1508 = vmatpush1.bf16.msra.mxu1 %v1389_v20  ;;  %v108_v6 = vunpack.c.h.bf16 %v72_v2  ;;  %v140_v7 = vunpack.c.h.bf16 %v88_v3  ;;  %v89_v9 = vld [vmem:[%s2066_s1 + $0xa0] sm:$0xff]  ;;  %v107_v10 = vunpack.c.l.bf16 %v72_v2  ;;  %v139_v11 = vunpack.c.l.bf16 %v88_v3  ;;  %v90_v15 = vld [vmem:[%s2066_s1 + $0xa8] sm:$0xff]  ;;  %v75_v20 = vld [vmem:[%s2066_s1 + $0x30] sm:$0xff] }
  0x16   :  { %1391 = vmatprep.subr.bf16.mxu0 %v1523_v4  ;;  %1493 = vmatprep.subr.bf16.mxu1 %v1523_v4  ;;  %v110_v12 = vunpack.c.h.bf16 %v73_v8  ;;  %v142_v13 = vunpack.c.h.bf16 %v89_v9  ;;  %v109_v16 = vunpack.c.l.bf16 %v73_v8  ;;  %v141_v17 = vunpack.c.l.bf16 %v89_v9  ;;  %v91_v21 = vld [vmem:[%s2066_s1 + $0xb0] sm:$0xff]  ;;  %v92_v27 = vld [vmem:[%s2066_s1 + $0xb8] sm:$0xff]  ;;  %v93_v33 = vld [vmem:[%s2066_s1 + $0xc0] sm:$0xff] }
  0x17   :  { %v112_v18 = vunpack.c.h.bf16 %v74_v14  ;;  %v144_v19 = vunpack.c.h.bf16 %v90_v15  ;;  %v111_v22 = vunpack.c.l.bf16 %v74_v14  ;;  %v114_v24 = vunpack.c.h.bf16 %v75_v20  ;;  %v94_v39 = vld [vmem:[%s2066_s1 + $0xc8] sm:$0xff]  ;;  %v95_v45 = vld [vmem:[%s2066_s1 + $0xd0] sm:$0xff]  ;;  %v96_v51 = vld [vmem:[%s2066_s1 + $0xd8] sm:$0xff] }
  0x18   :  { %v146_v25 = vunpack.c.h.bf16 %v91_v21  ;;  %v113_v28 = vunpack.c.l.bf16 %v75_v20  ;;  %v148_v31 = vunpack.c.h.bf16 %v92_v27  ;;  %v150_v37 = vunpack.c.h.bf16 %v93_v33 }
  0x19   :  { %1393 = vmatpush1.bf16.msra.mxu0 %v1392_v23  ;;  %1509 = vmatpush1.bf16.msra.mxu1 %v1392_v23  ;;  %v143_v23 = vunpack.c.l.bf16 %v90_v15  ;;  %v152_v43 = vunpack.c.h.bf16 %v94_v39  ;;  %v154_v49 = vunpack.c.h.bf16 %v95_v45  ;;  %v156_v55 = vunpack.c.h.bf16 %v96_v51 }
  0x1a   :  { %1394 = vmatprep.subr.bf16.mxu0 %v1523_v4  ;;  %1494 = vmatprep.subr.bf16.mxu1 %v1523_v4 }
  0x1d   :  { %1396 = vmatpush1.bf16.msra.mxu0 %v1395_v26  ;;  %1510 = vmatpush1.bf16.msra.mxu1 %v1395_v26  ;;  %v76_v26 = vld [vmem:[%s2066_s1 + $0x38] sm:$0xff] }
  0x1e   :  { %1397 = vmatprep.subr.bf16.mxu0 %v1523_v4  ;;  %1495 = vmatprep.subr.bf16.mxu1 %v1523_v4  ;;  %v116_v30 = vunpack.c.h.bf16 %v76_v26  ;;  %v115_v34 = vunpack.c.l.bf16 %v76_v26  ;;  %v166_v26 = vld [vmem:[#allocation2 + $0x8] sm:$0xff] }
  0x21   :  { %1399 = vmatpush1.bf16.msra.mxu0 %v1398_v29  ;;  %1511 = vmatpush1.bf16.msra.mxu1 %v1398_v29  ;;  %v145_v29 = vunpack.c.l.bf16 %v91_v21 }
  0x22   :  { %1400 = vmatprep.subr.bf16.mxu0 %v1523_v4  ;;  %1496 = vmatprep.subr.bf16.mxu1 %v1523_v4 }
  0x25   :  { %1402 = vmatpush1.bf16.msra.mxu0 %v1401_v32  ;;  %1512 = vmatpush1.bf16.msra.mxu1 %v1401_v32  ;;  %v77_v32 = vld [vmem:[%s2066_s1 + $0x40] sm:$0xff] }
  0x26   :  { %1403 = vmatprep.subr.bf16.mxu0 %v1523_v4  ;;  %1497 = vmatprep.subr.bf16.mxu1 %v1523_v4  ;;  %v118_v36 = vunpack.c.h.bf16 %v77_v32  ;;  %v117_v40 = vunpack.c.l.bf16 %v77_v32 }
  0x29   :  { %1405 = vmatpush1.bf16.msra.mxu0 %v1404_v35  ;;  %1513 = vmatpush1.bf16.msra.mxu1 %v1404_v35  ;;  %v147_v35 = vunpack.c.l.bf16 %v92_v27  ;;  %v182_v27 = vld [vmem:[#allocation2 + $0x88] sm:$0xff] }
  0x2a   :  { %1406 = vmatprep.subr.bf16.mxu0 %v1523_v4  ;;  %1498 = vmatprep.subr.bf16.mxu1 %v1523_v4 }
  0x2d   :  { %1408 = vmatpush1.bf16.msra.mxu0 %v1407_v38  ;;  %1514 = vmatpush1.bf16.msra.mxu1 %v1407_v38  ;;  %v78_v38 = vld [vmem:[%s2066_s1 + $0x48] sm:$0xff] }
  0x2e   :  { %1409 = vmatprep.subr.bf16.mxu0 %v1523_v4  ;;  %1499 = vmatprep.subr.bf16.mxu1 %v1523_v4  ;;  %v120_v42 = vunpack.c.h.bf16 %v78_v38  ;;  %v119_v46 = vunpack.c.l.bf16 %v78_v38 }
  0x31   :  { %1411 = vmatpush1.bf16.msra.mxu0 %v1410_v41  ;;  %1515 = vmatpush1.bf16.msra.mxu1 %v1410_v41  ;;  %v149_v41 = vunpack.c.l.bf16 %v93_v33 }
  0x32   :  { %1412 = vmatprep.subr.bf16.mxu0 %v1523_v4  ;;  %1500 = vmatprep.subr.bf16.mxu1 %v1523_v4 }
  0x35   :  { %1414 = vmatpush1.bf16.msra.mxu0 %v1413_v44  ;;  %1516 = vmatpush1.bf16.msra.mxu1 %v1413_v44  ;;  %v79_v44 = vld [vmem:[%s2066_s1 + $0x50] sm:$0xff] }
  0x36   :  { %1415 = vmatprep.subr.bf16.mxu0 %v1523_v4  ;;  %1501 = vmatprep.subr.bf16.mxu1 %v1523_v4  ;;  %v122_v48 = vunpack.c.h.bf16 %v79_v44  ;;  %v121_v52 = vunpack.c.l.bf16 %v79_v44 }
  0x39   :  { %1417 = vmatpush1.bf16.msra.mxu0 %v1416_v47  ;;  %1517 = vmatpush1.bf16.msra.mxu1 %v1416_v47  ;;  %v151_v47 = vunpack.c.l.bf16 %v94_v39 }
  0x3a   :  { %1418 = vmatprep.subr.bf16.mxu0 %v1523_v4  ;;  %1502 = vmatprep.subr.bf16.mxu1 %v1523_v4 }
  0x3d   :  { %1420 = vmatpush1.bf16.msra.mxu0 %v1419_v50  ;;  %1518 = vmatpush1.bf16.msra.mxu1 %v1419_v50  ;;  %v80_v50 = vld [vmem:[%s2066_s1 + $0x58] sm:$0xff] }
  0x3e   :  { %1421 = vmatprep.subr.bf16.mxu0 %v1523_v4  ;;  %1503 = vmatprep.subr.bf16.mxu1 %v1523_v4  ;;  %v105_v4 = vunpack.c.l.bf16 %v71_v60  ;;  %v124_v54 = vunpack.c.h.bf16 %v80_v50 }
  0x41   :  { %1423 = vmatpush1.bf16.msra.mxu0 %v1422_v53  ;;  %1519 = vmatpush1.bf16.msra.mxu1 %v1422_v53  ;;  %v153_v53 = vunpack.c.l.bf16 %v95_v45 }
  0x44   :  { %294 = vmatmul.mubr.f32.vlgmr.msra.gmra.mrb[0].mxu0 %v101_v56  ;;  %374 = vmatmul.mubr.f32.vlgmr.msra.gmra.mrb[0].mxu1 %v133_v57  ;;  %v81_v56 = vld [vmem:[%s2066_s1 + $0x60] sm:$0xff] }
  0x45   :  { %298 = vmatprep.mubr.f32.mxu0 %v104_v58  ;;  %378 = vmatprep.mubr.f32.mxu1 %v136_v59  ;;  %v97_v57 = vld [vmem:[%s2066_s1 + $0xe0] sm:$0xff]  ;;  %v123_v58 = vunpack.c.l.bf16 %v80_v50  ;;  %v155_v59 = vunpack.c.l.bf16 %v96_v51  ;;  %v126_v60 = vunpack.c.h.bf16 %v81_v56 }
  0x46   :  { %v158_v61 = vunpack.c.h.bf16 %v97_v57  ;;  %v169_v50 = vld [vmem:[#allocation2 + $0x20] sm:$0xff] }
  0x47   :  { %v185_v51 = vld [vmem:[#allocation2 + $0xa0] sm:$0xff] }
  0x48   :  { %299 = vmatmul.mubr.f32.gmra.mrb[2].mxu0 %v103_v62  ;;  %379 = vmatmul.mubr.f32.gmra.mrb[2].mxu1 %v135_v63  ;;  %v82_v62 = vld [vmem:[%s2066_s1 + $0x68] sm:$0xff] }
  0x49   :  { %303 = vmatprep.mubr.f32.mxu0 %v106_v0  ;;  %383 = vmatprep.mubr.f32.mxu1 %v138_v1  ;;  %v98_v63 = vld [vmem:[%s2066_s1 + $0xe8] sm:$0xff]  ;;  %v125_v0 = vunpack.c.l.bf16 %v81_v56  ;;  %v157_v1 = vunpack.c.l.bf16 %v97_v57  ;;  %v128_v2 = vunpack.c.h.bf16 %v82_v62 }
  0x4a   :  { %v160_v3 = vunpack.c.h.bf16 %v98_v63 }
  0x4c   :  { %304 = vmatmul.mubr.f32.gmra.mrb[4].mxu0 %v105_v4  ;;  %384 = vmatmul.mubr.f32.gmra.mrb[4].mxu1 %v137_v5  ;;  %v83_v4 = vld [vmem:[%s2066_s1 + $0x70] sm:$0xff] }
  0x4d   :  { %308 = vmatprep.mubr.f32.mxu0 %v108_v6  ;;  %388 = vmatprep.mubr.f32.mxu1 %v140_v7  ;;  %v99_v5 = vld [vmem:[%s2066_s1 + $0xf0] sm:$0xff]  ;;  %v127_v6 = vunpack.c.l.bf16 %v82_v62  ;;  %v159_v7 = vunpack.c.l.bf16 %v98_v63  ;;  %v130_v8 = vunpack.c.h.bf16 %v83_v4 }
  0x4e   :  { %v162_v9 = vunpack.c.h.bf16 %v99_v5 }
  0x50   :  { %309 = vmatmul.mubr.f32.gmra.mrb[6].mxu0 %v107_v10  ;;  %389 = vmatmul.mubr.f32.gmra.mrb[6].mxu1 %v139_v11  ;;  %v84_v10 = vld [vmem:[%s2066_s1 + $0x78] sm:$0xff] }
  0x51   :  { %313 = vmatprep.mubr.f32.mxu0 %v110_v12  ;;  %393 = vmatprep.mubr.f32.mxu1 %v142_v13  ;;  %v100_v11 = vld [vmem:[%s2066_s1 + $0xf8] sm:$0xff]  ;;  %v129_v12 = vunpack.c.l.bf16 %v83_v4  ;;  %v161_v13 = vunpack.c.l.bf16 %v99_v5  ;;  %v132_v14 = vunpack.c.h.bf16 %v84_v10 }
  0x52   :  { %v164_v15 = vunpack.c.h.bf16 %v100_v11 }
  0x54   :  { %314 = vmatmul.mubr.f32.gmra.mrb[8].mxu0 %v109_v16  ;;  %394 = vmatmul.mubr.f32.gmra.mrb[8].mxu1 %v141_v17  ;;  %v131_v16 = vunpack.c.l.bf16 %v84_v10  ;;  %v163_v17 = vunpack.c.l.bf16 %v100_v11  ;;  %v172_v10 = vld [vmem:[#allocation2 + $0x38] sm:$0xff] }
  0x55   :  { %318 = vmatprep.mubr.f32.mxu0 %v112_v18  ;;  %398 = vmatprep.mubr.f32.mxu1 %v144_v19  ;;  %v165_v18 = vld [vmem:[#allocation2] sm:$0xff]  ;;  %v188_v11 = vld [vmem:[#allocation2 + $0xb8] sm:$0xff] }
  0x56   :  { %v181_v19 = vld [vmem:[#allocation2 + $0x80] sm:$0xff] }
  0x58   :  { %319 = vmatmul.mubr.f32.gmra.mrb[10].mxu0 %v111_v22  ;;  %399 = vmatmul.mubr.f32.gmra.mrb[10].mxu1 %v143_v23 }
  0x59   :  { %323 = vmatprep.mubr.f32.mxu0 %v114_v24  ;;  %403 = vmatprep.mubr.f32.mxu1 %v146_v25 }
  0x5c   :  { %324 = vmatmul.mubr.f32.gmra.mrb[12].mxu0 %v113_v28  ;;  %404 = vmatmul.mubr.f32.gmra.mrb[12].mxu1 %v145_v29 }
  0x5d   :  { %328 = vmatprep.mubr.f32.mxu0 %v116_v30  ;;  %408 = vmatprep.mubr.f32.mxu1 %v148_v31 }
  0x60   :  { %329 = vmatmul.mubr.f32.gmra.mrb[14].mxu0 %v115_v34  ;;  %409 = vmatmul.mubr.f32.gmra.mrb[14].mxu1 %v147_v35  ;;  %v167_v34 = vld [vmem:[#allocation2 + $0x10] sm:$0xff] }
  0x61   :  { %333 = vmatprep.mubr.f32.mxu0 %v118_v36  ;;  %413 = vmatprep.mubr.f32.mxu1 %v150_v37  ;;  %v183_v35 = vld [vmem:[#allocation2 + $0x90] sm:$0xff] }
  0x64   :  { %334 = vmatmul.mubr.f32.gmra.mrb[16].mxu0 %v117_v40  ;;  %414 = vmatmul.mubr.f32.gmra.mrb[16].mxu1 %v149_v41 }
  0x65   :  { %338 = vmatprep.mubr.f32.mxu0 %v120_v42  ;;  %418 = vmatprep.mubr.f32.mxu1 %v152_v43  ;;  %v168_v42 = vld [vmem:[#allocation2 + $0x18] sm:$0xff] }
  0x66   :  { %v184_v43 = vld [vmem:[#allocation2 + $0x98] sm:$0xff] }
  0x68   :  { %339 = vmatmul.mubr.f32.gmra.mrb[18].mxu0 %v119_v46  ;;  %419 = vmatmul.mubr.f32.gmra.mrb[18].mxu1 %v151_v47 }
  0x69   :  { %343 = vmatprep.mubr.f32.mxu0 %v122_v48  ;;  %423 = vmatprep.mubr.f32.mxu1 %v154_v49 }
  0x6c   :  { %344 = vmatmul.mubr.f32.gmra.mrb[20].mxu0 %v121_v52  ;;  %424 = vmatmul.mubr.f32.gmra.mrb[20].mxu1 %v153_v53 }
  0x6d   :  { %348 = vmatprep.mubr.f32.mxu0 %v124_v54  ;;  %428 = vmatprep.mubr.f32.mxu1 %v156_v55 }
  0x70   :  { %349 = vmatmul.mubr.f32.gmra.mrb[22].mxu0 %v123_v58  ;;  %429 = vmatmul.mubr.f32.gmra.mrb[22].mxu1 %v155_v59  ;;  %v170_v58 = vld [vmem:[#allocation2 + $0x28] sm:$0xff] }
  0x71   :  { %353 = vmatprep.mubr.f32.mxu0 %v126_v60  ;;  %433 = vmatprep.mubr.f32.mxu1 %v158_v61  ;;  %v186_v59 = vld [vmem:[#allocation2 + $0xa8] sm:$0xff] }
  0x74   :  { %354 = vmatmul.mubr.f32.gmra.mrb[24].mxu0 %v125_v0  ;;  %434 = vmatmul.mubr.f32.gmra.mrb[24].mxu1 %v157_v1 }
  0x75   :  { %358 = vmatprep.mubr.f32.mxu0 %v128_v2  ;;  %438 = vmatprep.mubr.f32.mxu1 %v160_v3  ;;  %v171_v2 = vld [vmem:[#allocation2 + $0x30] sm:$0xff] }
  0x76   :  { %v187_v3 = vld [vmem:[#allocation2 + $0xb0] sm:$0xff] }
  0x78   :  { %359 = vmatmul.mubr.f32.gmra.mrb[26].mxu0 %v127_v6  ;;  %439 = vmatmul.mubr.f32.gmra.mrb[26].mxu1 %v159_v7 }
  0x79   :  { %363 = vmatprep.mubr.f32.mxu0 %v130_v8  ;;  %443 = vmatprep.mubr.f32.mxu1 %v162_v9 }
  0x7c   :  { %364 = vmatmul.mubr.f32.gmra.mrb[28].mxu0 %v129_v12  ;;  %444 = vmatmul.mubr.f32.gmra.mrb[28].mxu1 %v161_v13 }
  0x7d   :  { %368 = vmatprep.mubr.f32.mxu0 %v132_v14  ;;  %448 = vmatprep.mubr.f32.mxu1 %v164_v15 }
  0x80   :  { %369 = vmatmul.mubr.f32.gmra.mrb[30].mxu0 %v131_v16  ;;  %449 = vmatmul.mubr.f32.gmra.mrb[30].mxu1 %v163_v17 }
 0x117   :  { %v295_v20 = vpop.f32.mrb[0].mxu0  ;;  %v375_v21 = vpop.f32.mrb[0].mxu1 }
 0x118   :  { %v454_v22 = vadd.f32 %v295_v20, %v165_v18  ;;  %v470_v23 = vadd.f32 %v375_v21, %v181_v19  ;;  %v297_v24 = vpop.f32.mrb[1].mxu0  ;;  %v377_v25 = vpop.f32.mrb[1].mxu1  ;;  %v173_v18 = vld [vmem:[#allocation2 + $0x40] sm:$0xff] }
 0x119   :  { %v189_v19 = vld [vmem:[#allocation2 + $0xc0] sm:$0xff] }
 0x11a   :  { %486 = vst [vmem:[#allocation2] sm:$0xff] %v454_v22  ;;  %502 = vst [vmem:[#allocation2 + $0x80] sm:$0xff] %v470_v23 }
 0x11b   :  { %v300_v28 = vpop.f32.mrb[2].mxu0  ;;  %v380_v29 = vpop.f32.mrb[2].mxu1 }
 0x11c   :  { %v455_v30 = vadd.f32 %v300_v28, %v166_v26  ;;  %v471_v31 = vadd.f32 %v380_v29, %v182_v27  ;;  %v302_v32 = vpop.f32.mrb[3].mxu0  ;;  %v382_v33 = vpop.f32.mrb[3].mxu1  ;;  %v174_v26 = vld [vmem:[#allocation2 + $0x48] sm:$0xff] }
 0x11d   :  { %v190_v27 = vld [vmem:[#allocation2 + $0xc8] sm:$0xff] }
 0x11e   :  { %487 = vst [vmem:[#allocation2 + $0x8] sm:$0xff] %v455_v30  ;;  %503 = vst [vmem:[#allocation2 + $0x88] sm:$0xff] %v471_v31 }
 0x11f   :  { %v305_v36 = vpop.f32.mrb[4].mxu0  ;;  %v385_v37 = vpop.f32.mrb[4].mxu1 }
 0x120   :  { %v456_v38 = vadd.f32 %v305_v36, %v167_v34  ;;  %v472_v39 = vadd.f32 %v385_v37, %v183_v35  ;;  %v307_v40 = vpop.f32.mrb[5].mxu0  ;;  %v387_v41 = vpop.f32.mrb[5].mxu1  ;;  %v175_v34 = vld [vmem:[#allocation2 + $0x50] sm:$0xff] }
 0x121   :  { %v191_v35 = vld [vmem:[#allocation2 + $0xd0] sm:$0xff] }
 0x122   :  { %488 = vst [vmem:[#allocation2 + $0x10] sm:$0xff] %v456_v38  ;;  %504 = vst [vmem:[#allocation2 + $0x90] sm:$0xff] %v472_v39 }
 0x123   :  { %v310_v44 = vpop.f32.mrb[6].mxu0  ;;  %v390_v45 = vpop.f32.mrb[6].mxu1 }
 0x124   :  { %v457_v46 = vadd.f32 %v310_v44, %v168_v42  ;;  %v473_v47 = vadd.f32 %v390_v45, %v184_v43  ;;  %v312_v48 = vpop.f32.mrb[7].mxu0  ;;  %v392_v49 = vpop.f32.mrb[7].mxu1  ;;  %v176_v42 = vld [vmem:[#allocation2 + $0x58] sm:$0xff] }
 0x125   :  { %v192_v43 = vld [vmem:[#allocation2 + $0xd8] sm:$0xff] }
 0x126   :  { %489 = vst [vmem:[#allocation2 + $0x18] sm:$0xff] %v457_v46  ;;  %505 = vst [vmem:[#allocation2 + $0x98] sm:$0xff] %v473_v47 }
 0x127   :  { %v315_v52 = vpop.f32.mrb[8].mxu0  ;;  %v395_v53 = vpop.f32.mrb[8].mxu1 }
 0x128   :  { %v458_v54 = vadd.f32 %v315_v52, %v169_v50  ;;  %v474_v55 = vadd.f32 %v395_v53, %v185_v51  ;;  %v317_v56 = vpop.f32.mrb[9].mxu0  ;;  %v397_v57 = vpop.f32.mrb[9].mxu1  ;;  %v177_v50 = vld [vmem:[#allocation2 + $0x60] sm:$0xff] }
 0x129   :  { %v193_v51 = vld [vmem:[#allocation2 + $0xe0] sm:$0xff] }
 0x12a   :  { %490 = vst [vmem:[#allocation2 + $0x20] sm:$0xff] %v458_v54  ;;  %506 = vst [vmem:[#allocation2 + $0xa0] sm:$0xff] %v474_v55 }
 0x12b   :  { %v320_v60 = vpop.f32.mrb[10].mxu0  ;;  %v400_v61 = vpop.f32.mrb[10].mxu1 }
 0x12c   :  { %v459_v62 = vadd.f32 %v320_v60, %v170_v58  ;;  %v475_v63 = vadd.f32 %v400_v61, %v186_v59  ;;  %v322_v0 = vpop.f32.mrb[11].mxu0  ;;  %v402_v1 = vpop.f32.mrb[11].mxu1  ;;  %v178_v58 = vld [vmem:[#allocation2 + $0x68] sm:$0xff] }
 0x12d   :  { %v194_v59 = vld [vmem:[#allocation2 + $0xe8] sm:$0xff] }
 0x12e   :  { %491 = vst [vmem:[#allocation2 + $0x28] sm:$0xff] %v459_v62  ;;  %507 = vst [vmem:[#allocation2 + $0xa8] sm:$0xff] %v475_v63 }
 0x12f   :  { %v325_v4 = vpop.f32.mrb[12].mxu0  ;;  %v405_v5 = vpop.f32.mrb[12].mxu1 }
 0x130   :  { %v460_v6 = vadd.f32 %v325_v4, %v171_v2  ;;  %v476_v7 = vadd.f32 %v405_v5, %v187_v3  ;;  %v327_v8 = vpop.f32.mrb[13].mxu0  ;;  %v407_v9 = vpop.f32.mrb[13].mxu1  ;;  %v179_v2 = vld [vmem:[#allocation2 + $0x70] sm:$0xff] }
 0x131   :  { %v195_v3 = vld [vmem:[#allocation2 + $0xf0] sm:$0xff] }
 0x132   :  { %492 = vst [vmem:[#allocation2 + $0x30] sm:$0xff] %v460_v6  ;;  %508 = vst [vmem:[#allocation2 + $0xb0] sm:$0xff] %v476_v7 }
 0x133   :  { %v330_v12 = vpop.f32.mrb[14].mxu0  ;;  %v410_v13 = vpop.f32.mrb[14].mxu1 }
 0x134   :  { %v461_v14 = vadd.f32 %v330_v12, %v172_v10  ;;  %v477_v15 = vadd.f32 %v410_v13, %v188_v11  ;;  %v332_v16 = vpop.f32.mrb[15].mxu0  ;;  %v412_v17 = vpop.f32.mrb[15].mxu1  ;;  %v180_v10 = vld [vmem:[#allocation2 + $0x78] sm:$0xff] }
 0x135   :  { %v196_v11 = vld [vmem:[#allocation2 + $0xf8] sm:$0xff] }
 0x136   :  { %493 = vst [vmem:[#allocation2 + $0x38] sm:$0xff] %v461_v14  ;;  %509 = vst [vmem:[#allocation2 + $0xb8] sm:$0xff] %v477_v15 }
 0x137   :  { %v335_v20 = vpop.f32.mrb[16].mxu0  ;;  %v415_v21 = vpop.f32.mrb[16].mxu1 }
 0x138   :  { %v462_v22 = vadd.f32 %v335_v20, %v173_v18  ;;  %v478_v23 = vadd.f32 %v415_v21, %v189_v19  ;;  %v337_v24 = vpop.f32.mrb[17].mxu0  ;;  %v417_v25 = vpop.f32.mrb[17].mxu1 }
 0x13a   :  { %494 = vst [vmem:[#allocation2 + $0x40] sm:$0xff] %v462_v22  ;;  %510 = vst [vmem:[#allocation2 + $0xc0] sm:$0xff] %v478_v23 }
 0x13b   :  { %v340_v28 = vpop.f32.mrb[18].mxu0  ;;  %v420_v29 = vpop.f32.mrb[18].mxu1 }
 0x13c   :  { %v463_v30 = vadd.f32 %v340_v28, %v174_v26  ;;  %v479_v31 = vadd.f32 %v420_v29, %v190_v27  ;;  %v342_v32 = vpop.f32.mrb[19].mxu0  ;;  %v422_v33 = vpop.f32.mrb[19].mxu1 }
 0x13e   :  { %495 = vst [vmem:[#allocation2 + $0x48] sm:$0xff] %v463_v30  ;;  %511 = vst [vmem:[#allocation2 + $0xc8] sm:$0xff] %v479_v31 }
 0x13f   :  { %v345_v36 = vpop.f32.mrb[20].mxu0  ;;  %v425_v37 = vpop.f32.mrb[20].mxu1 }
 0x140   :  { %v464_v38 = vadd.f32 %v345_v36, %v175_v34  ;;  %v480_v39 = vadd.f32 %v425_v37, %v191_v35  ;;  %v347_v40 = vpop.f32.mrb[21].mxu0  ;;  %v427_v41 = vpop.f32.mrb[21].mxu1 }
 0x142   :  { %496 = vst [vmem:[#allocation2 + $0x50] sm:$0xff] %v464_v38  ;;  %512 = vst [vmem:[#allocation2 + $0xd0] sm:$0xff] %v480_v39 }
 0x143   :  { %v350_v44 = vpop.f32.mrb[22].mxu0  ;;  %v430_v45 = vpop.f32.mrb[22].mxu1 }
 0x144   :  { %v465_v46 = vadd.f32 %v350_v44, %v176_v42  ;;  %v481_v47 = vadd.f32 %v430_v45, %v192_v43  ;;  %v352_v48 = vpop.f32.mrb[23].mxu0  ;;  %v432_v49 = vpop.f32.mrb[23].mxu1 }
 0x146   :  { %497 = vst [vmem:[#allocation2 + $0x58] sm:$0xff] %v465_v46  ;;  %513 = vst [vmem:[#allocation2 + $0xd8] sm:$0xff] %v481_v47 }
 0x147   :  { %v355_v52 = vpop.f32.mrb[24].mxu0  ;;  %v435_v53 = vpop.f32.mrb[24].mxu1 }
 0x148   :  { %v466_v54 = vadd.f32 %v355_v52, %v177_v50  ;;  %v482_v55 = vadd.f32 %v435_v53, %v193_v51  ;;  %v357_v56 = vpop.f32.mrb[25].mxu0  ;;  %v437_v57 = vpop.f32.mrb[25].mxu1 }
 0x14a   :  { %498 = vst [vmem:[#allocation2 + $0x60] sm:$0xff] %v466_v54  ;;  %514 = vst [vmem:[#allocation2 + $0xe0] sm:$0xff] %v482_v55 }
 0x14b   :  { %v360_v60 = vpop.f32.mrb[26].mxu0  ;;  %v440_v61 = vpop.f32.mrb[26].mxu1 }
 0x14c   :  { %v467_v62 = vadd.f32 %v360_v60, %v178_v58  ;;  %v483_v63 = vadd.f32 %v440_v61, %v194_v59  ;;  %v362_v0 = vpop.f32.mrb[27].mxu0  ;;  %v442_v1 = vpop.f32.mrb[27].mxu1 }
 0x14e   :  { %499 = vst [vmem:[#allocation2 + $0x68] sm:$0xff] %v467_v62  ;;  %515 = vst [vmem:[#allocation2 + $0xe8] sm:$0xff] %v483_v63 }
 0x14f   :  { %v365_v4 = vpop.f32.mrb[28].mxu0  ;;  %v445_v5 = vpop.f32.mrb[28].mxu1 }
 0x150   :  { %v468_v6 = vadd.f32 %v365_v4, %v179_v2  ;;  %v484_v7 = vadd.f32 %v445_v5, %v195_v3  ;;  %v367_v8 = vpop.f32.mrb[29].mxu0  ;;  %v447_v9 = vpop.f32.mrb[29].mxu1 }
 0x152   :  { %500 = vst [vmem:[#allocation2 + $0x70] sm:$0xff] %v468_v6  ;;  %516 = vst [vmem:[#allocation2 + $0xf0] sm:$0xff] %v484_v7 }
 0x153   :  { %v370_v12 = vpop.f32.mrb[30].mxu0  ;;  %v450_v13 = vpop.f32.mrb[30].mxu1 }
 0x154   :  { %v469_v14 = vadd.f32 %v370_v12, %v180_v10  ;;  %v485_v15 = vadd.f32 %v450_v13, %v196_v11  ;;  %v372_v16 = vpop.f32.mrb[31].mxu0  ;;  %v452_v17 = vpop.f32.mrb[31].mxu1 }
 0x156   :  { %501 = vst [vmem:[#allocation2 + $0x78] sm:$0xff] %v469_v14  ;;  %517 = vst [vmem:[#allocation2 + $0xf8] sm:$0xff] %v485_v15 }
 0x157 PF:  { %v553_v18 = vld [vmem:[%s2068_s3] sm:$0xff]  ;;  %v554_v19 = vld [vmem:[%s2068_s3 + $0x8] sm:$0xff]  ;;  %v555_v20 = vld [vmem:[%s2068_s3 + $0x10] sm:$0xff] }
 0x158   :  { %v1424_v21 = vpack.c.bf16 %v554_v19, %v553_v18  ;;  %v556_v22 = vld [vmem:[%s2068_s3 + $0x18] sm:$0xff]  ;;  %v557_v24 = vld [vmem:[%s2068_s3 + $0x20] sm:$0xff]  ;;  %v558_v25 = vld [vmem:[%s2068_s3 + $0x28] sm:$0xff] }
 0x159   :  { %v1428_v23 = vpack.c.bf16 %v556_v22, %v555_v20  ;;  %v1432_v26 = vpack.c.bf16 %v558_v25, %v557_v24  ;;  %v521_v27 = vld [vmem:[#allocation2] sm:$0xff]  ;;  %v559_v28 = vld [vmem:[%s2068_s3 + $0x30] sm:$0xff]  ;;  %v560_v29 = vld [vmem:[%s2068_s3 + $0x38] sm:$0xff] }
 0x15a   :  { %1425 = vmatprep.subr.bf16.mxu0 %v1424_v21  ;;  %1248 = vmatprep.mubr.f32.mxu0 %v521_v27  ;;  %v1436_v30 = vpack.c.bf16 %v560_v29, %v559_v28  ;;  %v561_v31 = vld [vmem:[%s2068_s3 + $0x40] sm:$0xff]  ;;  %v562_v32 = vld [vmem:[%s2068_s3 + $0x48] sm:$0xff]  ;;  %v563_v34 = vld [vmem:[%s2068_s3 + $0x50] sm:$0xff] }
 0x15b   :  { %1427 = vmatpush3.bf16.msra.mxu0 %v1424_v21  ;;  %v1440_v33 = vpack.c.bf16 %v562_v32, %v561_v31  ;;  %v564_v35 = vld [vmem:[%s2068_s3 + $0x58] sm:$0xff]  ;;  %v833_v36 = vld [vmem:[%s2070_s5] sm:$0xff]  ;;  %v834_v37 = vld [vmem:[%s2070_s5 + $0x8] sm:$0xff] }
 0x15c   :  { %1429 = vmatprep.subr.bf16.mxu0 %v1428_v23  ;;  %v835_v38 = vld [vmem:[%s2070_s5 + $0x10] sm:$0xff]  ;;  %v1444_v39 = vpack.c.bf16 %v564_v35, %v563_v34  ;;  %v565_v40 = vld [vmem:[%s2068_s3 + $0x60] sm:$0xff]  ;;  %v1456_v41 = vpack.c.bf16 %v834_v37, %v833_v36  ;;  %v836_v42 = vld [vmem:[%s2070_s5 + $0x18] sm:$0xff] }
 0x15d   :  { %v566_v43 = vld [vmem:[%s2068_s3 + $0x68] sm:$0xff]  ;;  %v1460_v44 = vpack.c.bf16 %v836_v42, %v835_v38  ;;  %v837_v45 = vld [vmem:[%s2070_s5 + $0x20] sm:$0xff]  ;;  %v567_v48 = vld [vmem:[%s2068_s3 + $0x70] sm:$0xff] }
 0x15e   :  { %v838_v46 = vld [vmem:[%s2070_s5 + $0x28] sm:$0xff]  ;;  %1457 = vmatprep.subr.bf16.mxu1 %v1456_v41  ;;  %v1448_v47 = vpack.c.bf16 %v566_v43, %v565_v40  ;;  %v568_v50 = vld [vmem:[%s2068_s3 + $0x78] sm:$0xff]  ;;  %v839_v51 = vld [vmem:[%s2070_s5 + $0x30] sm:$0xff] }
 0x15f   :  { %1431 = vmatpush3.bf16.msra.mxu0 %v1428_v23  ;;  %1459 = vmatpush3.bf16.msra.mxu1 %v1456_v41  ;;  %v1464_v49 = vpack.c.bf16 %v838_v46, %v837_v45  ;;  %v840_v52 = vld [vmem:[%s2070_s5 + $0x38] sm:$0xff]  ;;  %v1452_v53 = vpack.c.bf16 %v568_v50, %v567_v48  ;;  %v841_v55 = vld [vmem:[%s2070_s5 + $0x40] sm:$0xff]  ;;  %v842_v56 = vld [vmem:[%s2070_s5 + $0x48] sm:$0xff] }
 0x160   :  { %1433 = vmatprep.subr.bf16.mxu0 %v1432_v26  ;;  %1461 = vmatprep.subr.bf16.mxu1 %v1460_v44  ;;  %v1468_v54 = vpack.c.bf16 %v840_v52, %v839_v51  ;;  %v1472_v57 = vpack.c.bf16 %v842_v56, %v841_v55  ;;  %v843_v58 = vld [vmem:[%s2070_s5 + $0x50] sm:$0xff]  ;;  %v844_v59 = vld [vmem:[%s2070_s5 + $0x58] sm:$0xff]  ;;  %v522_v60 = vld [vmem:[#allocation2 + $0x8] sm:$0xff] }
 0x161   :  { %v523_v61 = vld [vmem:[#allocation2 + $0x10] sm:$0xff]  ;;  %v1476_v62 = vpack.c.bf16 %v844_v59, %v843_v58  ;;  %v845_v63 = vld [vmem:[%s2070_s5 + $0x60] sm:$0xff]  ;;  %v846_v0 = vld [vmem:[%s2070_s5 + $0x68] sm:$0xff] }
 0x162   :  { %v524_v1 = vld [vmem:[#allocation2 + $0x18] sm:$0xff]  ;;  %v525_v2 = vld [vmem:[#allocation2 + $0x20] sm:$0xff]  ;;  %v1480_v3 = vpack.c.bf16 %v846_v0, %v845_v63  ;;  %v526_v4 = vld [vmem:[#allocation2 + $0x28] sm:$0xff] }
 0x163   :  { %1435 = vmatpush3.bf16.msra.mxu0 %v1432_v26  ;;  %1463 = vmatpush3.bf16.msra.mxu1 %v1460_v44  ;;  %v527_v5 = vld [vmem:[#allocation2 + $0x30] sm:$0xff]  ;;  %v528_v6 = vld [vmem:[#allocation2 + $0x38] sm:$0xff]  ;;  %v529_v7 = vld [vmem:[#allocation2 + $0x40] sm:$0xff] }
 0x164   :  { %1437 = vmatprep.subr.bf16.mxu0 %v1436_v30  ;;  %1465 = vmatprep.subr.bf16.mxu1 %v1464_v49  ;;  %v530_v8 = vld [vmem:[#allocation2 + $0x48] sm:$0xff]  ;;  %v531_v9 = vld [vmem:[#allocation2 + $0x50] sm:$0xff]  ;;  %v532_v10 = vld [vmem:[#allocation2 + $0x58] sm:$0xff] }
 0x165   :  { %v533_v11 = vld [vmem:[#allocation2 + $0x60] sm:$0xff]  ;;  %v534_v12 = vld [vmem:[#allocation2 + $0x68] sm:$0xff]  ;;  %v535_v13 = vld [vmem:[#allocation2 + $0x70] sm:$0xff] }
 0x166   :  { %v536_v14 = vld [vmem:[#allocation2 + $0x78] sm:$0xff]  ;;  %v537_v15 = vld [vmem:[#allocation2 + $0x80] sm:$0xff]  ;;  %v538_v16 = vld [vmem:[#allocation2 + $0x88] sm:$0xff] }
 0x167   :  { %1439 = vmatpush3.bf16.msra.mxu0 %v1436_v30  ;;  %1467 = vmatpush3.bf16.msra.mxu1 %v1464_v49  ;;  %v539_v17 = vld [vmem:[#allocation2 + $0x90] sm:$0xff]  ;;  %v540_v18 = vld [vmem:[#allocation2 + $0x98] sm:$0xff]  ;;  %v541_v19 = vld [vmem:[#allocation2 + $0xa0] sm:$0xff] }
 0x168   :  { %1441 = vmatprep.subr.bf16.mxu0 %v1440_v33  ;;  %1469 = vmatprep.subr.bf16.mxu1 %v1468_v54  ;;  %v542_v20 = vld [vmem:[#allocation2 + $0xa8] sm:$0xff]  ;;  %v543_v21 = vld [vmem:[#allocation2 + $0xb0] sm:$0xff]  ;;  %v544_v22 = vld [vmem:[#allocation2 + $0xb8] sm:$0xff] }
 0x169   :  { %v545_v23 = vld [vmem:[#allocation2 + $0xc0] sm:$0xff]  ;;  %v546_v24 = vld [vmem:[#allocation2 + $0xc8] sm:$0xff]  ;;  %v547_v25 = vld [vmem:[#allocation2 + $0xd0] sm:$0xff] }
 0x16a   :  { %v548_v26 = vld [vmem:[#allocation2 + $0xd8] sm:$0xff]  ;;  %v549_v27 = vld [vmem:[#allocation2 + $0xe0] sm:$0xff]  ;;  %v550_v28 = vld [vmem:[#allocation2 + $0xe8] sm:$0xff] }
 0x16b   :  { %1443 = vmatpush3.bf16.msra.mxu0 %v1440_v33  ;;  %1471 = vmatpush3.bf16.msra.mxu1 %v1468_v54  ;;  %v551_v29 = vld [vmem:[#allocation2 + $0xf0] sm:$0xff]  ;;  %v552_v30 = vld [vmem:[#allocation2 + $0xf8] sm:$0xff]  ;;  %v1898_v34 = vld [vmem:[%s2069_s4] ss:$0 sm:$0xff] }
 0x16c   :  { %1445 = vmatprep.subr.bf16.mxu0 %v1444_v39  ;;  %1473 = vmatprep.subr.bf16.mxu1 %v1472_v57  ;;  %v847_v31 = vld [vmem:[%s2070_s5 + $0x70] sm:$0xff]  ;;  %v848_v32 = vld [vmem:[%s2070_s5 + $0x78] sm:$0xff] }
 0x16d   :  { %v1484_v33 = vpack.c.bf16 %v848_v32, %v847_v31 }
 0x16f   :  { %1447 = vmatpush3.bf16.msra.mxu0 %v1444_v39  ;;  %1475 = vmatpush3.bf16.msra.mxu1 %v1472_v57 }
 0x170   :  { %1449 = vmatprep.subr.bf16.mxu0 %v1448_v47  ;;  %1477 = vmatprep.subr.bf16.mxu1 %v1476_v62 }
 0x173   :  { %1451 = vmatpush3.bf16.msra.mxu0 %v1448_v47  ;;  %1479 = vmatpush3.bf16.msra.mxu1 %v1476_v62 }
 0x174   :  { %1453 = vmatprep.subr.bf16.mxu0 %v1452_v53  ;;  %1481 = vmatprep.subr.bf16.mxu1 %v1480_v3 }
 0x177   :  { %1455 = vmatpush3.bf16.msra.mxu0 %v1452_v53  ;;  %1483 = vmatpush3.bf16.msra.mxu1 %v1480_v3 }
 0x178   :  { %1485 = vmatprep.subr.bf16.mxu1 %v1484_v33 }
 0x17a   :  { %1249 = vmatmul.mubr.f32.vlgmr.msra.gmra.mrb[0].mxu0 %v522_v60 }
 0x17b   :  { %1251 = vmatprep.mubr.f32.mxu0 %v523_v61  ;;  %1487 = vmatpush3.bf16.msra.mxu1 %v1484_v33 }
 0x17e   :  { %1252 = vmatmul.mubr.f32.gmra.mrb[2].mxu0 %v524_v1 }
 0x17f   :  { %1254 = vmatprep.mubr.f32.mxu0 %v525_v2 }
 0x182   :  { %1255 = vmatmul.mubr.f32.gmra.mrb[4].mxu0 %v526_v4 }
 0x183   :  { %1257 = vmatprep.mubr.f32.mxu0 %v527_v5 }
 0x186   :  { %1258 = vmatmul.mubr.f32.gmra.mrb[6].mxu0 %v528_v6 }
 0x187   :  { %1260 = vmatprep.mubr.f32.mxu0 %v529_v7 }
 0x18a   :  { %1261 = vmatmul.mubr.f32.gmra.mrb[8].mxu0 %v530_v8 }
 0x18b   :  { %1263 = vmatprep.mubr.f32.mxu0 %v531_v9 }
 0x18e   :  { %1264 = vmatmul.mubr.f32.gmra.mrb[10].mxu0 %v532_v10 }
 0x18f   :  { %1266 = vmatprep.mubr.f32.mxu0 %v533_v11 }
 0x192   :  { %1267 = vmatmul.mubr.f32.gmra.mrb[12].mxu0 %v534_v12 }
 0x193   :  { %1269 = vmatprep.mubr.f32.mxu0 %v535_v13 }
 0x196   :  { %1270 = vmatmul.mubr.f32.gmra.mrb[14].mxu0 %v536_v14 }
 0x197   :  { %1272 = vmatprep.mubr.f32.mxu0 %v537_v15 }
 0x19a   :  { %1273 = vmatmul.mubr.f32.gmra.mrb[16].mxu0 %v538_v16 }
 0x19b   :  { %1275 = vmatprep.mubr.f32.mxu0 %v539_v17 }
 0x19e   :  { %1276 = vmatmul.mubr.f32.gmra.mrb[18].mxu0 %v540_v18 }
 0x19f   :  { %1278 = vmatprep.mubr.f32.mxu0 %v541_v19 }
 0x1a2   :  { %1279 = vmatmul.mubr.f32.gmra.mrb[20].mxu0 %v542_v20 }
 0x1a3   :  { %1281 = vmatprep.mubr.f32.mxu0 %v543_v21 }
 0x1a6   :  { %1282 = vmatmul.mubr.f32.gmra.mrb[22].mxu0 %v544_v22 }
 0x1a7   :  { %1284 = vmatprep.mubr.f32.mxu0 %v545_v23 }
 0x1aa   :  { %1285 = vmatmul.mubr.f32.gmra.mrb[24].mxu0 %v546_v24 }
 0x1ab   :  { %1287 = vmatprep.mubr.f32.mxu0 %v547_v25 }
 0x1ae   :  { %1288 = vmatmul.mubr.f32.gmra.mrb[26].mxu0 %v548_v26 }
 0x1af   :  { %1290 = vmatprep.mubr.f32.mxu0 %v549_v27 }
 0x1b2   :  { %1291 = vmatmul.mubr.f32.gmra.mrb[28].mxu0 %v550_v28 }
 0x1b3   :  { %1293 = vmatprep.mubr.f32.mxu0 %v551_v29 }
 0x1b6   :  { %1294 = vmatmul.mubr.f32.gmra.mrb[30].mxu0 %v552_v30 }
 0x24d   :  { %v1250_v35 = vpop.f32.mrb[0].mxu0 }
 0x24e   :  { %v648_v36 = vadd.f32 %v1250_v35, %v1898_v34  ;;  %v642_v37 = vpop.f32.mrb[1].mxu0 }
 0x24f   :  { %v643_v38 = vadd.f32 %v1898_v34, %v642_v37 }
 0x250   :  { %v802_v41 = vmax.f32 %v648_v36, 0.0 }
 0x251   :  { %v1253_v39 = vpop.f32.mrb[2].mxu0  ;;  %v801_v40 = vmax.f32 %v643_v38, 0.0 }
 0x252   :  { %v658_v42 = vadd.f32 %v1253_v39, %v1898_v34  ;;  %v652_v43 = vpop.f32.mrb[3].mxu0 }
 0x253   :  { %v653_v44 = vadd.f32 %v1898_v34, %v652_v43  ;;  %1328 = vmatprep.mubr.f32.mxu1 %v801_v40 }
 0x254   :  { %1329 = vmatmul.mubr.f32.vlgmr.msra.gmra.mrb[0].mxu1 %v802_v41  ;;  %v804_v47 = vmax.f32 %v658_v42, 0.0 }
 0x255   :  { %v803_v45 = vmax.f32 %v653_v44, 0.0  ;;  %v1256_v46 = vpop.f32.mrb[4].mxu0 }
 0x256   :  { %v668_v48 = vadd.f32 %v1256_v46, %v1898_v34  ;;  %v662_v49 = vpop.f32.mrb[5].mxu0 }
 0x257   :  { %v663_v50 = vadd.f32 %v1898_v34, %v662_v49  ;;  %1331 = vmatprep.mubr.f32.mxu1 %v803_v45 }
 0x258   :  { %1332 = vmatmul.mubr.f32.gmra.mrb[2].mxu1 %v804_v47  ;;  %v806_v53 = vmax.f32 %v668_v48, 0.0 }
 0x259   :  { %v805_v51 = vmax.f32 %v663_v50, 0.0  ;;  %v1259_v52 = vpop.f32.mrb[6].mxu0 }
 0x25a   :  { %v678_v54 = vadd.f32 %v1259_v52, %v1898_v34  ;;  %v672_v55 = vpop.f32.mrb[7].mxu0 }
 0x25b   :  { %v673_v56 = vadd.f32 %v1898_v34, %v672_v55  ;;  %1334 = vmatprep.mubr.f32.mxu1 %v805_v51 }
 0x25c   :  { %1335 = vmatmul.mubr.f32.gmra.mrb[4].mxu1 %v806_v53  ;;  %v808_v59 = vmax.f32 %v678_v54, 0.0 }
 0x25d   :  { %v807_v57 = vmax.f32 %v673_v56, 0.0  ;;  %v1262_v58 = vpop.f32.mrb[8].mxu0 }
 0x25e   :  { %v688_v60 = vadd.f32 %v1262_v58, %v1898_v34  ;;  %v682_v61 = vpop.f32.mrb[9].mxu0 }
 0x25f   :  { %v683_v62 = vadd.f32 %v1898_v34, %v682_v61  ;;  %1337 = vmatprep.mubr.f32.mxu1 %v807_v57 }
 0x260   :  { %1338 = vmatmul.mubr.f32.gmra.mrb[6].mxu1 %v808_v59  ;;  %v810_v1 = vmax.f32 %v688_v60, 0.0 }
 0x261   :  { %v809_v63 = vmax.f32 %v683_v62, 0.0  ;;  %v1265_v0 = vpop.f32.mrb[10].mxu0 }
 0x262   :  { %v698_v2 = vadd.f32 %v1265_v0, %v1898_v34  ;;  %v692_v3 = vpop.f32.mrb[11].mxu0 }
 0x263   :  { %v693_v4 = vadd.f32 %v1898_v34, %v692_v3  ;;  %1340 = vmatprep.mubr.f32.mxu1 %v809_v63 }
 0x264   :  { %1341 = vmatmul.mubr.f32.gmra.mrb[8].mxu1 %v810_v1  ;;  %v812_v7 = vmax.f32 %v698_v2, 0.0 }
 0x265   :  { %v811_v5 = vmax.f32 %v693_v4, 0.0  ;;  %v1268_v6 = vpop.f32.mrb[12].mxu0  ;;  %v1935_v4 = vld [vmem:[%s2071_s6] ss:$0 sm:$0xff] }
 0x266   :  { %v708_v8 = vadd.f32 %v1268_v6, %v1898_v34  ;;  %v702_v9 = vpop.f32.mrb[13].mxu0 }
 0x267   :  { %v703_v10 = vadd.f32 %v1898_v34, %v702_v9  ;;  %1343 = vmatprep.mubr.f32.mxu1 %v811_v5 }
 0x268   :  { %1344 = vmatmul.mubr.f32.gmra.mrb[10].mxu1 %v812_v7  ;;  %v814_v13 = vmax.f32 %v708_v8, 0.0 }
 0x269   :  { %v813_v11 = vmax.f32 %v703_v10, 0.0  ;;  %v1271_v12 = vpop.f32.mrb[14].mxu0 }
 0x26a   :  { %v718_v14 = vadd.f32 %v1271_v12, %v1898_v34  ;;  %v712_v15 = vpop.f32.mrb[15].mxu0 }
 0x26b   :  { %v713_v16 = vadd.f32 %v1898_v34, %v712_v15  ;;  %1346 = vmatprep.mubr.f32.mxu1 %v813_v11 }
 0x26c   :  { %1347 = vmatmul.mubr.f32.gmra.mrb[12].mxu1 %v814_v13  ;;  %v816_v19 = vmax.f32 %v718_v14, 0.0 }
 0x26d   :  { %v815_v17 = vmax.f32 %v713_v16, 0.0  ;;  %v1274_v18 = vpop.f32.mrb[16].mxu0 }
 0x26e   :  { %v728_v20 = vadd.f32 %v1274_v18, %v1898_v34  ;;  %v722_v21 = vpop.f32.mrb[17].mxu0 }
 0x26f   :  { %v723_v22 = vadd.f32 %v1898_v34, %v722_v21  ;;  %1349 = vmatprep.mubr.f32.mxu1 %v815_v17 }
 0x270   :  { %1350 = vmatmul.mubr.f32.gmra.mrb[14].mxu1 %v816_v19  ;;  %v818_v25 = vmax.f32 %v728_v20, 0.0 }
 0x271   :  { %v817_v23 = vmax.f32 %v723_v22, 0.0  ;;  %v1277_v24 = vpop.f32.mrb[18].mxu0 }
 0x272   :  { %v738_v26 = vadd.f32 %v1277_v24, %v1898_v34  ;;  %v732_v27 = vpop.f32.mrb[19].mxu0 }
 0x273   :  { %v733_v28 = vadd.f32 %v1898_v34, %v732_v27  ;;  %1352 = vmatprep.mubr.f32.mxu1 %v817_v23 }
 0x274   :  { %1353 = vmatmul.mubr.f32.gmra.mrb[16].mxu1 %v818_v25  ;;  %v820_v31 = vmax.f32 %v738_v26, 0.0 }
 0x275   :  { %v819_v29 = vmax.f32 %v733_v28, 0.0  ;;  %v1280_v30 = vpop.f32.mrb[20].mxu0 }
 0x276   :  { %v748_v32 = vadd.f32 %v1280_v30, %v1898_v34  ;;  %v742_v33 = vpop.f32.mrb[21].mxu0 }
 0x277   :  { %v743_v35 = vadd.f32 %v1898_v34, %v742_v33  ;;  %1355 = vmatprep.mubr.f32.mxu1 %v819_v29 }
 0x278   :  { %1356 = vmatmul.mubr.f32.gmra.mrb[18].mxu1 %v820_v31  ;;  %v822_v38 = vmax.f32 %v748_v32, 0.0 }
 0x279   :  { %v821_v36 = vmax.f32 %v743_v35, 0.0  ;;  %v1283_v37 = vpop.f32.mrb[22].mxu0 }
 0x27a   :  { %v758_v39 = vadd.f32 %v1283_v37, %v1898_v34  ;;  %v752_v40 = vpop.f32.mrb[23].mxu0 }
 0x27b   :  { %v753_v41 = vadd.f32 %v1898_v34, %v752_v40  ;;  %1358 = vmatprep.mubr.f32.mxu1 %v821_v36 }
 0x27c   :  { %1359 = vmatmul.mubr.f32.gmra.mrb[20].mxu1 %v822_v38  ;;  %v824_v44 = vmax.f32 %v758_v39, 0.0 }
 0x27d   :  { %v823_v42 = vmax.f32 %v753_v41, 0.0  ;;  %v1286_v43 = vpop.f32.mrb[24].mxu0 }
 0x27e   :  { %v768_v45 = vadd.f32 %v1286_v43, %v1898_v34  ;;  %v762_v46 = vpop.f32.mrb[25].mxu0 }
 0x27f   :  { %v763_v47 = vadd.f32 %v1898_v34, %v762_v46  ;;  %1361 = vmatprep.mubr.f32.mxu1 %v823_v42 }
 0x280   :  { %1362 = vmatmul.mubr.f32.gmra.mrb[22].mxu1 %v824_v44  ;;  %v826_v50 = vmax.f32 %v768_v45, 0.0 }
 0x281   :  { %v825_v48 = vmax.f32 %v763_v47, 0.0  ;;  %v1289_v49 = vpop.f32.mrb[26].mxu0 }
 0x282   :  { %v778_v51 = vadd.f32 %v1289_v49, %v1898_v34  ;;  %v772_v52 = vpop.f32.mrb[27].mxu0 }
 0x283   :  { %v773_v53 = vadd.f32 %v1898_v34, %v772_v52  ;;  %1364 = vmatprep.mubr.f32.mxu1 %v825_v48 }
 0x284   :  { %1365 = vmatmul.mubr.f32.gmra.mrb[24].mxu1 %v826_v50  ;;  %v828_v56 = vmax.f32 %v778_v51, 0.0 }
 0x285   :  { %v827_v54 = vmax.f32 %v773_v53, 0.0  ;;  %v1292_v55 = vpop.f32.mrb[28].mxu0 }
 0x286   :  { %v788_v57 = vadd.f32 %v1292_v55, %v1898_v34  ;;  %v782_v58 = vpop.f32.mrb[29].mxu0 }
 0x287   :  { %v783_v59 = vadd.f32 %v1898_v34, %v782_v58  ;;  %1367 = vmatprep.mubr.f32.mxu1 %v827_v54 }
 0x288   :  { %1368 = vmatmul.mubr.f32.gmra.mrb[26].mxu1 %v828_v56  ;;  %v830_v62 = vmax.f32 %v788_v57, 0.0 }
 0x289   :  { %v829_v60 = vmax.f32 %v783_v59, 0.0  ;;  %v1295_v61 = vpop.f32.mrb[30].mxu0 }
 0x28a   :  { %v798_v63 = vadd.f32 %v1295_v61, %v1898_v34  ;;  %v792_v0 = vpop.f32.mrb[31].mxu0 }
 0x28b   :  { %v793_v1 = vadd.f32 %v1898_v34, %v792_v0  ;;  %1370 = vmatprep.mubr.f32.mxu1 %v829_v60 }
 0x28c   :  { %1371 = vmatmul.mubr.f32.gmra.mrb[28].mxu1 %v830_v62  ;;  %v832_v3 = vmax.f32 %v798_v63, 0.0 }
 0x28d   :  { %v831_v2 = vmax.f32 %v793_v1, 0.0 }
 0x28f   :  { %1373 = vmatprep.mubr.f32.mxu1 %v831_v2 }
 0x290   :  { %1374 = vmatmul.mubr.f32.gmra.mrb[30].mxu1 %v832_v3 }
 0x327   :  { %v1330_v5 = vpop.f32.mrb[0].mxu1 }
 0x328   :  { %v928_v6 = vadd.f32 %v1330_v5, %v1935_v4  ;;  %v922_v7 = vpop.f32.mrb[1].mxu1 }
 0x329   :  { %v923_v8 = vadd.f32 %v1935_v4, %v922_v7 }
 0x32a   :  { %1082 = vst [vmem:[%s2072_s7 + $0x8] sm:$0xff] %v928_v6 }
 0x32b   :  { %1081 = vst [vmem:[%s2072_s7] sm:$0xff] %v923_v8  ;;  %v1333_v34 = vpop.f32.mrb[2].mxu1 }
 0x32c   :  { %v938_v9 = vadd.f32 %v1333_v34, %v1935_v4  ;;  %v932_v10 = vpop.f32.mrb[3].mxu1 }
 0x32d   :  { %v933_v11 = vadd.f32 %v1935_v4, %v932_v10 }
 0x32e   :  { %1084 = vst [vmem:[%s2072_s7 + $0x18] sm:$0xff] %v938_v9 }
 0x32f   :  { %1083 = vst [vmem:[%s2072_s7 + $0x10] sm:$0xff] %v933_v11  ;;  %v1336_v12 = vpop.f32.mrb[4].mxu1 }
 0x330   :  { %v948_v13 = vadd.f32 %v1336_v12, %v1935_v4  ;;  %v942_v14 = vpop.f32.mrb[5].mxu1 }
 0x331   :  { %v943_v15 = vadd.f32 %v1935_v4, %v942_v14 }
 0x332   :  { %1086 = vst [vmem:[%s2072_s7 + $0x28] sm:$0xff] %v948_v13 }
 0x333   :  { %1085 = vst [vmem:[%s2072_s7 + $0x20] sm:$0xff] %v943_v15  ;;  %v1339_v16 = vpop.f32.mrb[6].mxu1 }
 0x334   :  { %v958_v17 = vadd.f32 %v1339_v16, %v1935_v4  ;;  %v952_v18 = vpop.f32.mrb[7].mxu1 }
 0x335   :  { %v953_v19 = vadd.f32 %v1935_v4, %v952_v18 }
 0x336   :  { %1088 = vst [vmem:[%s2072_s7 + $0x38] sm:$0xff] %v958_v17 }
 0x337   :  { %1087 = vst [vmem:[%s2072_s7 + $0x30] sm:$0xff] %v953_v19  ;;  %v1342_v20 = vpop.f32.mrb[8].mxu1 }
 0x338   :  { %v968_v21 = vadd.f32 %v1342_v20, %v1935_v4  ;;  %v962_v22 = vpop.f32.mrb[9].mxu1 }
 0x339   :  { %v963_v23 = vadd.f32 %v1935_v4, %v962_v22 }
 0x33a   :  { %1090 = vst [vmem:[%s2072_s7 + $0x48] sm:$0xff] %v968_v21 }
 0x33b   :  { %1089 = vst [vmem:[%s2072_s7 + $0x40] sm:$0xff] %v963_v23  ;;  %v1345_v24 = vpop.f32.mrb[10].mxu1 }
 0x33c   :  { %v978_v25 = vadd.f32 %v1345_v24, %v1935_v4  ;;  %v972_v26 = vpop.f32.mrb[11].mxu1 }
 0x33d   :  { %v973_v27 = vadd.f32 %v1935_v4, %v972_v26 }
 0x33e   :  { %1092 = vst [vmem:[%s2072_s7 + $0x58] sm:$0xff] %v978_v25 }
 0x33f   :  { %1091 = vst [vmem:[%s2072_s7 + $0x50] sm:$0xff] %v973_v27  ;;  %v1348_v28 = vpop.f32.mrb[12].mxu1 }
 0x340   :  { %v988_v29 = vadd.f32 %v1348_v28, %v1935_v4  ;;  %v982_v30 = vpop.f32.mrb[13].mxu1 }
 0x341   :  { %v983_v31 = vadd.f32 %v1935_v4, %v982_v30 }
 0x342   :  { %1094 = vst [vmem:[%s2072_s7 + $0x68] sm:$0xff] %v988_v29 }
 0x343   :  { %1093 = vst [vmem:[%s2072_s7 + $0x60] sm:$0xff] %v983_v31  ;;  %v1351_v32 = vpop.f32.mrb[14].mxu1 }
 0x344   :  { %v998_v33 = vadd.f32 %v1351_v32, %v1935_v4  ;;  %v992_v35 = vpop.f32.mrb[15].mxu1 }
 0x345   :  { %v993_v36 = vadd.f32 %v1935_v4, %v992_v35 }
 0x346   :  { %1096 = vst [vmem:[%s2072_s7 + $0x78] sm:$0xff] %v998_v33 }
 0x347   :  { %1095 = vst [vmem:[%s2072_s7 + $0x70] sm:$0xff] %v993_v36  ;;  %v1354_v37 = vpop.f32.mrb[16].mxu1 }
 0x348   :  { %v1008_v38 = vadd.f32 %v1354_v37, %v1935_v4  ;;  %v1002_v39 = vpop.f32.mrb[17].mxu1 }
 0x349   :  { %v1003_v40 = vadd.f32 %v1935_v4, %v1002_v39 }
 0x34a   :  { %1098 = vst [vmem:[%s2072_s7 + $0x88] sm:$0xff] %v1008_v38 }
 0x34b   :  { %1097 = vst [vmem:[%s2072_s7 + $0x80] sm:$0xff] %v1003_v40  ;;  %v1357_v41 = vpop.f32.mrb[18].mxu1 }
 0x34c   :  { %v1018_v42 = vadd.f32 %v1357_v41, %v1935_v4  ;;  %v1012_v43 = vpop.f32.mrb[19].mxu1 }
 0x34d   :  { %v1013_v44 = vadd.f32 %v1935_v4, %v1012_v43 }
 0x34e   :  { %1100 = vst [vmem:[%s2072_s7 + $0x98] sm:$0xff] %v1018_v42 }
 0x34f   :  { %1099 = vst [vmem:[%s2072_s7 + $0x90] sm:$0xff] %v1013_v44  ;;  %v1360_v45 = vpop.f32.mrb[20].mxu1 }
 0x350   :  { %v1028_v46 = vadd.f32 %v1360_v45, %v1935_v4  ;;  %v1022_v47 = vpop.f32.mrb[21].mxu1 }
 0x351   :  { %v1023_v48 = vadd.f32 %v1935_v4, %v1022_v47 }
 0x352   :  { %1102 = vst [vmem:[%s2072_s7 + $0xa8] sm:$0xff] %v1028_v46 }
 0x353   :  { %1101 = vst [vmem:[%s2072_s7 + $0xa0] sm:$0xff] %v1023_v48  ;;  %v1363_v49 = vpop.f32.mrb[22].mxu1 }
 0x354   :  { %v1038_v50 = vadd.f32 %v1363_v49, %v1935_v4  ;;  %v1032_v51 = vpop.f32.mrb[23].mxu1 }
 0x355   :  { %v1033_v52 = vadd.f32 %v1935_v4, %v1032_v51 }
 0x356   :  { %1104 = vst [vmem:[%s2072_s7 + $0xb8] sm:$0xff] %v1038_v50 }
 0x357   :  { %1103 = vst [vmem:[%s2072_s7 + $0xb0] sm:$0xff] %v1033_v52  ;;  %v1366_v53 = vpop.f32.mrb[24].mxu1 }
 0x358   :  { %v1048_v54 = vadd.f32 %v1366_v53, %v1935_v4  ;;  %v1042_v55 = vpop.f32.mrb[25].mxu1 }
 0x359   :  { %v1043_v56 = vadd.f32 %v1935_v4, %v1042_v55 }
 0x35a   :  { %1106 = vst [vmem:[%s2072_s7 + $0xc8] sm:$0xff] %v1048_v54 }
 0x35b   :  { %1105 = vst [vmem:[%s2072_s7 + $0xc0] sm:$0xff] %v1043_v56  ;;  %v1369_v57 = vpop.f32.mrb[26].mxu1 }
 0x35c   :  { %v1058_v58 = vadd.f32 %v1369_v57, %v1935_v4  ;;  %v1052_v59 = vpop.f32.mrb[27].mxu1 }
 0x35d   :  { %v1053_v60 = vadd.f32 %v1935_v4, %v1052_v59 }
 0x35e   :  { %1108 = vst [vmem:[%s2072_s7 + $0xd8] sm:$0xff] %v1058_v58 }
 0x35f   :  { %1107 = vst [vmem:[%s2072_s7 + $0xd0] sm:$0xff] %v1053_v60  ;;  %v1372_v61 = vpop.f32.mrb[28].mxu1 }
 0x360   :  { %v1068_v62 = vadd.f32 %v1372_v61, %v1935_v4  ;;  %v1062_v63 = vpop.f32.mrb[29].mxu1 }
 0x361   :  { %v1063_v0 = vadd.f32 %v1935_v4, %v1062_v63 }
 0x362   :  { %1110 = vst [vmem:[%s2072_s7 + $0xe8] sm:$0xff] %v1068_v62 }
 0x363   :  { %1109 = vst [vmem:[%s2072_s7 + $0xe0] sm:$0xff] %v1063_v0  ;;  %v1375_v1 = vpop.f32.mrb[30].mxu1 }
 0x364   :  { %v1078_v2 = vadd.f32 %v1375_v1, %v1935_v4  ;;  %v1072_v3 = vpop.f32.mrb[31].mxu1 }
 0x365   :  { %v1073_v5 = vadd.f32 %v1935_v4, %v1072_v3 }
 0x366   :  { %1112 = vst [vmem:[%s2072_s7 + $0xf8] sm:$0xff] %v1078_v2 }
 0x367   :  { %1111 = vst [vmem:[%s2072_s7 + $0xf0] sm:$0xff] %v1073_v5 }

// kernel: gin_block_pallas.2
= control target key start
LH: loop header
LB: loop body
LE: loop exit
PB: predicated region body
PF: predicated region fallthrough
CT: control target
= control target key end

     0   :  { %v1554_v0 = vmov 0.0   ;;  %s2097_s0 = inlined_call_operand.<no memory space> [shape: s32[1,1], index: 0, kind: input, shape index: {}]   ;;  %s2098_s1 = inlined_call_operand.vmem [shape: bf16[256,256], index: 1, kind: input, shape index: {}]   ;;  %s2099_s2 = inlined_call_operand.vmem [shape: f32[256,128], index: 2, kind: input, shape index: {}]   ;;  %s2100_s3 = inlined_call_operand.vmem [shape: f32[128,128], index: 3, kind: input, shape index: {}]   ;;  %s2101_s4 = inlined_call_operand.vmem [shape: f32[1,128], index: 4, kind: input, shape index: {}]   ;;  %s2102_s5 = inlined_call_operand.vmem [shape: f32[128,128], index: 5, kind: input, shape index: {}]   ;;  %s2103_s6 = inlined_call_operand.vmem [shape: f32[1,128], index: 6, kind: input, shape index: {}]   ;;  %s2104_s7 = inlined_call_operand.vmem [shape: f32[256,128], index: 7, kind: output, shape index: {}]  }
   0x1   :  { %29 = vst [vmem:[#allocation2] sm:$0xff] %v1554_v0  ;;  %30 = vst [vmem:[#allocation2 + $0x8] sm:$0xff] %v1554_v0  ;;  %p1149_p0 = scmp.eq.s32.totalorder %s2097_s0, 0 }
   0x2   :  { %31 = vst [vmem:[#allocation2 + $0x10] sm:$0xff] %v1554_v0  ;;  %32 = vst [vmem:[#allocation2 + $0x18] sm:$0xff] %v1554_v0  ;;  %v197_v1 = vld [vmem:[%s2099_s2] sm:$0xff] (!%p1149_p0)  ;;  %v198_v2 = vld [vmem:[%s2099_s2 + $0x8] sm:$0xff] (!%p1149_p0)  ;;  %v1555_v4 = vmov (!%p1149_p0), 0.0|0.0  }
   0x3   :  { %33 = vst [vmem:[#allocation2 + $0x20] sm:$0xff] %v1554_v0  ;;  %34 = vst [vmem:[#allocation2 + $0x28] sm:$0xff] %v1554_v0  ;;  %v199_v3 = vld [vmem:[%s2099_s2 + $0x10] sm:$0xff] (!%p1149_p0)  ;;  %1408 = vmatprep.subr.bf16.mxu0 (!%p1149_p0), %v1555_v4  ;;  %1520 = vmatprep.subr.bf16.mxu1 (!%p1149_p0), %v1555_v4  ;;  %v1409_v5 = vpack.c.bf16 (!%p1149_p0), %v198_v2, %v197_v1  ;;  %v200_v6 = vld [vmem:[%s2099_s2 + $0x18] sm:$0xff] (!%p1149_p0) }
   0x4   :  { %35 = vst [vmem:[#allocation2 + $0x30] sm:$0xff] %v1554_v0  ;;  %36 = vst [vmem:[#allocation2 + $0x38] sm:$0xff] %v1554_v0  ;;  %v1412_v7 = vpack.c.bf16 (!%p1149_p0), %v200_v6, %v199_v3  ;;  %v201_v8 = vld [vmem:[%s2099_s2 + $0x20] sm:$0xff] (!%p1149_p0)  ;;  %v202_v9 = vld [vmem:[%s2099_s2 + $0x28] sm:$0xff] (!%p1149_p0) }
   0x5   :  { %37 = vst [vmem:[#allocation2 + $0x40] sm:$0xff] %v1554_v0  ;;  %38 = vst [vmem:[#allocation2 + $0x48] sm:$0xff] %v1554_v0  ;;  %1410 = vmatpush1.bf16.msra.mxu0 (!%p1149_p0), %v1409_v5  ;;  %1536 = vmatpush1.bf16.msra.mxu1 (!%p1149_p0), %v1409_v5  ;;  %v1415_v10 = vpack.c.bf16 (!%p1149_p0), %v202_v9, %v201_v8  ;;  %v203_v11 = vld [vmem:[%s2099_s2 + $0x30] sm:$0xff] (!%p1149_p0)  ;;  %v204_v12 = vld [vmem:[%s2099_s2 + $0x38] sm:$0xff] (!%p1149_p0) }
   0x6   :  { %39 = vst [vmem:[#allocation2 + $0x50] sm:$0xff] %v1554_v0  ;;  %40 = vst [vmem:[#allocation2 + $0x58] sm:$0xff] %v1554_v0  ;;  %1411 = vmatprep.subr.bf16.mxu0 (!%p1149_p0), %v1555_v4  ;;  %1521 = vmatprep.subr.bf16.mxu1 (!%p1149_p0), %v1555_v4  ;;  %v1632_v13 = vld [vmem:[%s2098_s1] sm:$0xff] (!%p1149_p0)  ;;  %v1418_v14 = vpack.c.bf16 (!%p1149_p0), %v204_v12, %v203_v11  ;;  %v206_v18 = vld [vmem:[%s2099_s2 + $0x48] sm:$0xff] (!%p1149_p0) }
   0x7   :  { %41 = vst [vmem:[#allocation2 + $0x60] sm:$0xff] %v1554_v0  ;;  %42 = vst [vmem:[#allocation2 + $0x68] sm:$0xff] %v1554_v0  ;;  %v102_v15 = vunpack.c.h.bf16 (!%p1149_p0), %v1632_v13  ;;  %v1638_v16 = vld [vmem:[%s2098_s1 + $0x80] sm:$0xff] (!%p1149_p0)  ;;  %v207_v21 = vld [vmem:[%s2099_s2 + $0x50] sm:$0xff] (!%p1149_p0)  ;;  %v101_v56 = vunpack.c.l.bf16 (!%p1149_p0), %v1632_v13 }
   0x8   :  { %43 = vst [vmem:[#allocation2 + $0x70] sm:$0xff] %v1554_v0  ;;  %44 = vst [vmem:[#allocation2 + $0x78] sm:$0xff] %v1554_v0  ;;  %v205_v17 = vld [vmem:[%s2099_s2 + $0x40] sm:$0xff] (!%p1149_p0)  ;;  %v134_v19 = vunpack.c.h.bf16 (!%p1149_p0), %v1638_v16  ;;  %v208_v22 = vld [vmem:[%s2099_s2 + $0x58] sm:$0xff] (!%p1149_p0)  ;;  %v133_v57 = vunpack.c.l.bf16 (!%p1149_p0), %v1638_v16 }
   0x9   :  { %45 = vst [vmem:[#allocation2 + $0x80] sm:$0xff] %v1554_v0  ;;  %46 = vst [vmem:[#allocation2 + $0x88] sm:$0xff] %v1554_v0  ;;  %1413 = vmatpush1.bf16.msra.mxu0 (!%p1149_p0), %v1412_v7  ;;  %1537 = vmatpush1.bf16.msra.mxu1 (!%p1149_p0), %v1412_v7  ;;  %v1421_v20 = vpack.c.bf16 (!%p1149_p0), %v206_v18, %v205_v17  ;;  %v1424_v23 = vpack.c.bf16 (!%p1149_p0), %v208_v22, %v207_v21  ;;  %v209_v24 = vld [vmem:[%s2099_s2 + $0x60] sm:$0xff] (!%p1149_p0)  ;;  %v210_v25 = vld [vmem:[%s2099_s2 + $0x68] sm:$0xff] (!%p1149_p0) }
   0xa   :  { %47 = vst [vmem:[#allocation2 + $0x90] sm:$0xff] %v1554_v0  ;;  %48 = vst [vmem:[#allocation2 + $0x98] sm:$0xff] %v1554_v0  ;;  %68 = sbr.rel (%p1149_p0) target bundleno = 343 (0x157), region = 33  ;;  %1414 = vmatprep.subr.bf16.mxu0 (!%p1149_p0), %v1555_v4  ;;  %1522 = vmatprep.subr.bf16.mxu1 (!%p1149_p0), %v1555_v4  ;;  %v1427_v26 = vpack.c.bf16 (!%p1149_p0), %v210_v25, %v209_v24  ;;  %v211_v27 = vld [vmem:[%s2099_s2 + $0x70] sm:$0xff] (!%p1149_p0)  ;;  %v212_v28 = vld [vmem:[%s2099_s2 + $0x78] sm:$0xff] (!%p1149_p0) }
   0xb   :  { %49 = vst [vmem:[#allocation2 + $0xa0] sm:$0xff] %v1554_v0  ;;  %50 = vst [vmem:[#allocation2 + $0xa8] sm:$0xff] %v1554_v0  ;;  %293 = vmatprep.mubr.f32.mxu0 (!%p1149_p0), %v102_v15  ;;  %373 = vmatprep.mubr.f32.mxu1 (!%p1149_p0), %v134_v19  ;;  %v1430_v29 = vpack.c.bf16 (!%p1149_p0), %v212_v28, %v211_v27  ;;  %v213_v30 = vld [vmem:[%s2099_s2 + $0x80] sm:$0xff] (!%p1149_p0)  ;;  %v214_v31 = vld [vmem:[%s2099_s2 + $0x88] sm:$0xff] (!%p1149_p0) }
   0xc   :  { %51 = vst [vmem:[#allocation2 + $0xb0] sm:$0xff] %v1554_v0  ;;  %52 = vst [vmem:[#allocation2 + $0xb8] sm:$0xff] %v1554_v0  ;;  %v1433_v32 = vpack.c.bf16 (!%p1149_p0), %v214_v31, %v213_v30  ;;  %v215_v33 = vld [vmem:[%s2099_s2 + $0x90] sm:$0xff] (!%p1149_p0)  ;;  %v216_v34 = vld [vmem:[%s2099_s2 + $0x98] sm:$0xff] (!%p1149_p0) }
   0xd   :  { %53 = vst [vmem:[#allocation2 + $0xc0] sm:$0xff] %v1554_v0  ;;  %54 = vst [vmem:[#allocation2 + $0xc8] sm:$0xff] %v1554_v0  ;;  %1416 = vmatpush1.bf16.msra.mxu0 (!%p1149_p0), %v1415_v10  ;;  %1538 = vmatpush1.bf16.msra.mxu1 (!%p1149_p0), %v1415_v10  ;;  %v1436_v35 = vpack.c.bf16 (!%p1149_p0), %v216_v34, %v215_v33  ;;  %v217_v36 = vld [vmem:[%s2099_s2 + $0xa0] sm:$0xff] (!%p1149_p0)  ;;  %v218_v37 = vld [vmem:[%s2099_s2 + $0xa8] sm:$0xff] (!%p1149_p0) }
   0xe   :  { %55 = vst [vmem:[#allocation2 + $0xd0] sm:$0xff] %v1554_v0  ;;  %56 = vst [vmem:[#allocation2 + $0xd8] sm:$0xff] %v1554_v0  ;;  %1417 = vmatprep.subr.bf16.mxu0 (!%p1149_p0), %v1555_v4  ;;  %1523 = vmatprep.subr.bf16.mxu1 (!%p1149_p0), %v1555_v4  ;;  %v1439_v38 = vpack.c.bf16 (!%p1149_p0), %v218_v37, %v217_v36  ;;  %v219_v39 = vld [vmem:[%s2099_s2 + $0xb0] sm:$0xff] (!%p1149_p0)  ;;  %v220_v40 = vld [vmem:[%s2099_s2 + $0xb8] sm:$0xff] (!%p1149_p0) }
   0xf   :  { %57 = vst [vmem:[#allocation2 + $0xe0] sm:$0xff] %v1554_v0  ;;  %58 = vst [vmem:[#allocation2 + $0xe8] sm:$0xff] %v1554_v0  ;;  %v1442_v41 = vpack.c.bf16 (!%p1149_p0), %v220_v40, %v219_v39  ;;  %v221_v42 = vld [vmem:[%s2099_s2 + $0xc0] sm:$0xff] (!%p1149_p0)  ;;  %v222_v43 = vld [vmem:[%s2099_s2 + $0xc8] sm:$0xff] (!%p1149_p0) }
  0x10   :  { %59 = vst [vmem:[#allocation2 + $0xf0] sm:$0xff] %v1554_v0  ;;  %60 = vst [vmem:[#allocation2 + $0xf8] sm:$0xff] %v1554_v0  ;;  %v1445_v44 = vpack.c.bf16 (!%p1149_p0), %v222_v43, %v221_v42  ;;  %v223_v45 = vld [vmem:[%s2099_s2 + $0xd0] sm:$0xff] (!%p1149_p0)  ;;  %v224_v46 = vld [vmem:[%s2099_s2 + $0xd8] sm:$0xff] (!%p1149_p0) }
  0x11   :  { %1419 = vmatpush1.bf16.msra.mxu0 %v1418_v14  ;;  %1539 = vmatpush1.bf16.msra.mxu1 %v1418_v14  ;;  %v1448_v47 = vpack.c.bf16 %v224_v46, %v223_v45  ;;  %v225_v48 = vld [vmem:[%s2099_s2 + $0xe0] sm:$0xff]  ;;  %v226_v49 = vld [vmem:[%s2099_s2 + $0xe8] sm:$0xff]  ;;  %v227_v51 = vld [vmem:[%s2099_s2 + $0xf0] sm:$0xff] }
  0x12   :  { %1420 = vmatprep.subr.bf16.mxu0 %v1555_v4  ;;  %1524 = vmatprep.subr.bf16.mxu1 %v1555_v4  ;;  %v1451_v50 = vpack.c.bf16 %v226_v49, %v225_v48  ;;  %v228_v52 = vld [vmem:[%s2099_s2 + $0xf8] sm:$0xff]  ;;  %v70_v54 = vld [vmem:[%s2098_s1 + $0x8] sm:$0xff]  ;;  %v71_v60 = vld [vmem:[%s2098_s1 + $0x10] sm:$0xff] }
  0x13   :  { %v1454_v53 = vpack.c.bf16 %v228_v52, %v227_v51  ;;  %v86_v55 = vld [vmem:[%s2098_s1 + $0x88] sm:$0xff]  ;;  %v104_v58 = vunpack.c.h.bf16 %v70_v54  ;;  %v87_v61 = vld [vmem:[%s2098_s1 + $0x90] sm:$0xff]  ;;  %v103_v62 = vunpack.c.l.bf16 %v70_v54  ;;  %v106_v0 = vunpack.c.h.bf16 %v71_v60  ;;  %v72_v2 = vld [vmem:[%s2098_s1 + $0x18] sm:$0xff] }
  0x14   :  { %v136_v59 = vunpack.c.h.bf16 %v86_v55  ;;  %v135_v63 = vunpack.c.l.bf16 %v86_v55  ;;  %v138_v1 = vunpack.c.h.bf16 %v87_v61  ;;  %v88_v3 = vld [vmem:[%s2098_s1 + $0x98] sm:$0xff]  ;;  %v137_v5 = vunpack.c.l.bf16 %v87_v61  ;;  %v73_v8 = vld [vmem:[%s2098_s1 + $0x20] sm:$0xff]  ;;  %v74_v14 = vld [vmem:[%s2098_s1 + $0x28] sm:$0xff] }
  0x15   :  { %1422 = vmatpush1.bf16.msra.mxu0 %v1421_v20  ;;  %1540 = vmatpush1.bf16.msra.mxu1 %v1421_v20  ;;  %v108_v6 = vunpack.c.h.bf16 %v72_v2  ;;  %v140_v7 = vunpack.c.h.bf16 %v88_v3  ;;  %v89_v9 = vld [vmem:[%s2098_s1 + $0xa0] sm:$0xff]  ;;  %v107_v10 = vunpack.c.l.bf16 %v72_v2  ;;  %v139_v11 = vunpack.c.l.bf16 %v88_v3  ;;  %v90_v15 = vld [vmem:[%s2098_s1 + $0xa8] sm:$0xff]  ;;  %v75_v20 = vld [vmem:[%s2098_s1 + $0x30] sm:$0xff] }
  0x16   :  { %1423 = vmatprep.subr.bf16.mxu0 %v1555_v4  ;;  %1525 = vmatprep.subr.bf16.mxu1 %v1555_v4  ;;  %v110_v12 = vunpack.c.h.bf16 %v73_v8  ;;  %v142_v13 = vunpack.c.h.bf16 %v89_v9  ;;  %v109_v16 = vunpack.c.l.bf16 %v73_v8  ;;  %v141_v17 = vunpack.c.l.bf16 %v89_v9  ;;  %v91_v21 = vld [vmem:[%s2098_s1 + $0xb0] sm:$0xff]  ;;  %v92_v27 = vld [vmem:[%s2098_s1 + $0xb8] sm:$0xff]  ;;  %v93_v33 = vld [vmem:[%s2098_s1 + $0xc0] sm:$0xff] }
  0x17   :  { %v112_v18 = vunpack.c.h.bf16 %v74_v14  ;;  %v144_v19 = vunpack.c.h.bf16 %v90_v15  ;;  %v111_v22 = vunpack.c.l.bf16 %v74_v14  ;;  %v114_v24 = vunpack.c.h.bf16 %v75_v20  ;;  %v94_v39 = vld [vmem:[%s2098_s1 + $0xc8] sm:$0xff]  ;;  %v95_v45 = vld [vmem:[%s2098_s1 + $0xd0] sm:$0xff]  ;;  %v96_v51 = vld [vmem:[%s2098_s1 + $0xd8] sm:$0xff] }
  0x18   :  { %v146_v25 = vunpack.c.h.bf16 %v91_v21  ;;  %v113_v28 = vunpack.c.l.bf16 %v75_v20  ;;  %v148_v31 = vunpack.c.h.bf16 %v92_v27  ;;  %v150_v37 = vunpack.c.h.bf16 %v93_v33 }
  0x19   :  { %1425 = vmatpush1.bf16.msra.mxu0 %v1424_v23  ;;  %1541 = vmatpush1.bf16.msra.mxu1 %v1424_v23  ;;  %v143_v23 = vunpack.c.l.bf16 %v90_v15  ;;  %v152_v43 = vunpack.c.h.bf16 %v94_v39  ;;  %v154_v49 = vunpack.c.h.bf16 %v95_v45  ;;  %v156_v55 = vunpack.c.h.bf16 %v96_v51 }
  0x1a   :  { %1426 = vmatprep.subr.bf16.mxu0 %v1555_v4  ;;  %1526 = vmatprep.subr.bf16.mxu1 %v1555_v4 }
  0x1d   :  { %1428 = vmatpush1.bf16.msra.mxu0 %v1427_v26  ;;  %1542 = vmatpush1.bf16.msra.mxu1 %v1427_v26  ;;  %v76_v26 = vld [vmem:[%s2098_s1 + $0x38] sm:$0xff] }
  0x1e   :  { %1429 = vmatprep.subr.bf16.mxu0 %v1555_v4  ;;  %1527 = vmatprep.subr.bf16.mxu1 %v1555_v4  ;;  %v116_v30 = vunpack.c.h.bf16 %v76_v26  ;;  %v115_v34 = vunpack.c.l.bf16 %v76_v26  ;;  %v166_v26 = vld [vmem:[#allocation2 + $0x8] sm:$0xff] }
  0x21   :  { %1431 = vmatpush1.bf16.msra.mxu0 %v1430_v29  ;;  %1543 = vmatpush1.bf16.msra.mxu1 %v1430_v29  ;;  %v145_v29 = vunpack.c.l.bf16 %v91_v21 }
  0x22   :  { %1432 = vmatprep.subr.bf16.mxu0 %v1555_v4  ;;  %1528 = vmatprep.subr.bf16.mxu1 %v1555_v4 }
  0x25   :  { %1434 = vmatpush1.bf16.msra.mxu0 %v1433_v32  ;;  %1544 = vmatpush1.bf16.msra.mxu1 %v1433_v32  ;;  %v77_v32 = vld [vmem:[%s2098_s1 + $0x40] sm:$0xff] }
  0x26   :  { %1435 = vmatprep.subr.bf16.mxu0 %v1555_v4  ;;  %1529 = vmatprep.subr.bf16.mxu1 %v1555_v4  ;;  %v118_v36 = vunpack.c.h.bf16 %v77_v32  ;;  %v117_v40 = vunpack.c.l.bf16 %v77_v32 }
  0x29   :  { %1437 = vmatpush1.bf16.msra.mxu0 %v1436_v35  ;;  %1545 = vmatpush1.bf16.msra.mxu1 %v1436_v35  ;;  %v147_v35 = vunpack.c.l.bf16 %v92_v27  ;;  %v182_v27 = vld [vmem:[#allocation2 + $0x88] sm:$0xff] }
  0x2a   :  { %1438 = vmatprep.subr.bf16.mxu0 %v1555_v4  ;;  %1530 = vmatprep.subr.bf16.mxu1 %v1555_v4 }
  0x2d   :  { %1440 = vmatpush1.bf16.msra.mxu0 %v1439_v38  ;;  %1546 = vmatpush1.bf16.msra.mxu1 %v1439_v38  ;;  %v78_v38 = vld [vmem:[%s2098_s1 + $0x48] sm:$0xff] }
  0x2e   :  { %1441 = vmatprep.subr.bf16.mxu0 %v1555_v4  ;;  %1531 = vmatprep.subr.bf16.mxu1 %v1555_v4  ;;  %v120_v42 = vunpack.c.h.bf16 %v78_v38  ;;  %v119_v46 = vunpack.c.l.bf16 %v78_v38 }
  0x31   :  { %1443 = vmatpush1.bf16.msra.mxu0 %v1442_v41  ;;  %1547 = vmatpush1.bf16.msra.mxu1 %v1442_v41  ;;  %v149_v41 = vunpack.c.l.bf16 %v93_v33 }
  0x32   :  { %1444 = vmatprep.subr.bf16.mxu0 %v1555_v4  ;;  %1532 = vmatprep.subr.bf16.mxu1 %v1555_v4 }
  0x35   :  { %1446 = vmatpush1.bf16.msra.mxu0 %v1445_v44  ;;  %1548 = vmatpush1.bf16.msra.mxu1 %v1445_v44  ;;  %v79_v44 = vld [vmem:[%s2098_s1 + $0x50] sm:$0xff] }
  0x36   :  { %1447 = vmatprep.subr.bf16.mxu0 %v1555_v4  ;;  %1533 = vmatprep.subr.bf16.mxu1 %v1555_v4  ;;  %v122_v48 = vunpack.c.h.bf16 %v79_v44  ;;  %v121_v52 = vunpack.c.l.bf16 %v79_v44 }
  0x39   :  { %1449 = vmatpush1.bf16.msra.mxu0 %v1448_v47  ;;  %1549 = vmatpush1.bf16.msra.mxu1 %v1448_v47  ;;  %v151_v47 = vunpack.c.l.bf16 %v94_v39 }
  0x3a   :  { %1450 = vmatprep.subr.bf16.mxu0 %v1555_v4  ;;  %1534 = vmatprep.subr.bf16.mxu1 %v1555_v4 }
  0x3d   :  { %1452 = vmatpush1.bf16.msra.mxu0 %v1451_v50  ;;  %1550 = vmatpush1.bf16.msra.mxu1 %v1451_v50  ;;  %v80_v50 = vld [vmem:[%s2098_s1 + $0x58] sm:$0xff] }
  0x3e   :  { %1453 = vmatprep.subr.bf16.mxu0 %v1555_v4  ;;  %1535 = vmatprep.subr.bf16.mxu1 %v1555_v4  ;;  %v105_v4 = vunpack.c.l.bf16 %v71_v60  ;;  %v124_v54 = vunpack.c.h.bf16 %v80_v50 }
  0x41   :  { %1455 = vmatpush1.bf16.msra.mxu0 %v1454_v53  ;;  %1551 = vmatpush1.bf16.msra.mxu1 %v1454_v53  ;;  %v153_v53 = vunpack.c.l.bf16 %v95_v45 }
  0x44   :  { %294 = vmatmul.mubr.f32.vlgmr.msra.gmra.mrb[0].mxu0 %v101_v56  ;;  %374 = vmatmul.mubr.f32.vlgmr.msra.gmra.mrb[0].mxu1 %v133_v57  ;;  %v81_v56 = vld [vmem:[%s2098_s1 + $0x60] sm:$0xff] }
  0x45   :  { %298 = vmatprep.mubr.f32.mxu0 %v104_v58  ;;  %378 = vmatprep.mubr.f32.mxu1 %v136_v59  ;;  %v97_v57 = vld [vmem:[%s2098_s1 + $0xe0] sm:$0xff]  ;;  %v123_v58 = vunpack.c.l.bf16 %v80_v50  ;;  %v155_v59 = vunpack.c.l.bf16 %v96_v51  ;;  %v126_v60 = vunpack.c.h.bf16 %v81_v56 }
  0x46   :  { %v158_v61 = vunpack.c.h.bf16 %v97_v57  ;;  %v169_v50 = vld [vmem:[#allocation2 + $0x20] sm:$0xff] }
  0x47   :  { %v185_v51 = vld [vmem:[#allocation2 + $0xa0] sm:$0xff] }
  0x48   :  { %299 = vmatmul.mubr.f32.gmra.mrb[2].mxu0 %v103_v62  ;;  %379 = vmatmul.mubr.f32.gmra.mrb[2].mxu1 %v135_v63  ;;  %v82_v62 = vld [vmem:[%s2098_s1 + $0x68] sm:$0xff] }
  0x49   :  { %303 = vmatprep.mubr.f32.mxu0 %v106_v0  ;;  %383 = vmatprep.mubr.f32.mxu1 %v138_v1  ;;  %v98_v63 = vld [vmem:[%s2098_s1 + $0xe8] sm:$0xff]  ;;  %v125_v0 = vunpack.c.l.bf16 %v81_v56  ;;  %v157_v1 = vunpack.c.l.bf16 %v97_v57  ;;  %v128_v2 = vunpack.c.h.bf16 %v82_v62 }
  0x4a   :  { %v160_v3 = vunpack.c.h.bf16 %v98_v63 }
  0x4c   :  { %304 = vmatmul.mubr.f32.gmra.mrb[4].mxu0 %v105_v4  ;;  %384 = vmatmul.mubr.f32.gmra.mrb[4].mxu1 %v137_v5  ;;  %v83_v4 = vld [vmem:[%s2098_s1 + $0x70] sm:$0xff] }
  0x4d   :  { %308 = vmatprep.mubr.f32.mxu0 %v108_v6  ;;  %388 = vmatprep.mubr.f32.mxu1 %v140_v7  ;;  %v99_v5 = vld [vmem:[%s2098_s1 + $0xf0] sm:$0xff]  ;;  %v127_v6 = vunpack.c.l.bf16 %v82_v62  ;;  %v159_v7 = vunpack.c.l.bf16 %v98_v63  ;;  %v130_v8 = vunpack.c.h.bf16 %v83_v4 }
  0x4e   :  { %v162_v9 = vunpack.c.h.bf16 %v99_v5 }
  0x50   :  { %309 = vmatmul.mubr.f32.gmra.mrb[6].mxu0 %v107_v10  ;;  %389 = vmatmul.mubr.f32.gmra.mrb[6].mxu1 %v139_v11  ;;  %v84_v10 = vld [vmem:[%s2098_s1 + $0x78] sm:$0xff] }
  0x51   :  { %313 = vmatprep.mubr.f32.mxu0 %v110_v12  ;;  %393 = vmatprep.mubr.f32.mxu1 %v142_v13  ;;  %v100_v11 = vld [vmem:[%s2098_s1 + $0xf8] sm:$0xff]  ;;  %v129_v12 = vunpack.c.l.bf16 %v83_v4  ;;  %v161_v13 = vunpack.c.l.bf16 %v99_v5  ;;  %v132_v14 = vunpack.c.h.bf16 %v84_v10 }
  0x52   :  { %v164_v15 = vunpack.c.h.bf16 %v100_v11 }
  0x54   :  { %314 = vmatmul.mubr.f32.gmra.mrb[8].mxu0 %v109_v16  ;;  %394 = vmatmul.mubr.f32.gmra.mrb[8].mxu1 %v141_v17  ;;  %v131_v16 = vunpack.c.l.bf16 %v84_v10  ;;  %v163_v17 = vunpack.c.l.bf16 %v100_v11  ;;  %v172_v10 = vld [vmem:[#allocation2 + $0x38] sm:$0xff] }
  0x55   :  { %318 = vmatprep.mubr.f32.mxu0 %v112_v18  ;;  %398 = vmatprep.mubr.f32.mxu1 %v144_v19  ;;  %v165_v18 = vld [vmem:[#allocation2] sm:$0xff]  ;;  %v188_v11 = vld [vmem:[#allocation2 + $0xb8] sm:$0xff] }
  0x56   :  { %v181_v19 = vld [vmem:[#allocation2 + $0x80] sm:$0xff] }
  0x58   :  { %319 = vmatmul.mubr.f32.gmra.mrb[10].mxu0 %v111_v22  ;;  %399 = vmatmul.mubr.f32.gmra.mrb[10].mxu1 %v143_v23 }
  0x59   :  { %323 = vmatprep.mubr.f32.mxu0 %v114_v24  ;;  %403 = vmatprep.mubr.f32.mxu1 %v146_v25 }
  0x5c   :  { %324 = vmatmul.mubr.f32.gmra.mrb[12].mxu0 %v113_v28  ;;  %404 = vmatmul.mubr.f32.gmra.mrb[12].mxu1 %v145_v29 }
  0x5d   :  { %328 = vmatprep.mubr.f32.mxu0 %v116_v30  ;;  %408 = vmatprep.mubr.f32.mxu1 %v148_v31 }
  0x60   :  { %329 = vmatmul.mubr.f32.gmra.mrb[14].mxu0 %v115_v34  ;;  %409 = vmatmul.mubr.f32.gmra.mrb[14].mxu1 %v147_v35  ;;  %v167_v34 = vld [vmem:[#allocation2 + $0x10] sm:$0xff] }
  0x61   :  { %333 = vmatprep.mubr.f32.mxu0 %v118_v36  ;;  %413 = vmatprep.mubr.f32.mxu1 %v150_v37  ;;  %v183_v35 = vld [vmem:[#allocation2 + $0x90] sm:$0xff] }
  0x64   :  { %334 = vmatmul.mubr.f32.gmra.mrb[16].mxu0 %v117_v40  ;;  %414 = vmatmul.mubr.f32.gmra.mrb[16].mxu1 %v149_v41 }
  0x65   :  { %338 = vmatprep.mubr.f32.mxu0 %v120_v42  ;;  %418 = vmatprep.mubr.f32.mxu1 %v152_v43  ;;  %v168_v42 = vld [vmem:[#allocation2 + $0x18] sm:$0xff] }
  0x66   :  { %v184_v43 = vld [vmem:[#allocation2 + $0x98] sm:$0xff] }
  0x68   :  { %339 = vmatmul.mubr.f32.gmra.mrb[18].mxu0 %v119_v46  ;;  %419 = vmatmul.mubr.f32.gmra.mrb[18].mxu1 %v151_v47 }
  0x69   :  { %343 = vmatprep.mubr.f32.mxu0 %v122_v48  ;;  %423 = vmatprep.mubr.f32.mxu1 %v154_v49 }
  0x6c   :  { %344 = vmatmul.mubr.f32.gmra.mrb[20].mxu0 %v121_v52  ;;  %424 = vmatmul.mubr.f32.gmra.mrb[20].mxu1 %v153_v53 }
  0x6d   :  { %348 = vmatprep.mubr.f32.mxu0 %v124_v54  ;;  %428 = vmatprep.mubr.f32.mxu1 %v156_v55 }
  0x70   :  { %349 = vmatmul.mubr.f32.gmra.mrb[22].mxu0 %v123_v58  ;;  %429 = vmatmul.mubr.f32.gmra.mrb[22].mxu1 %v155_v59  ;;  %v170_v58 = vld [vmem:[#allocation2 + $0x28] sm:$0xff] }
  0x71   :  { %353 = vmatprep.mubr.f32.mxu0 %v126_v60  ;;  %433 = vmatprep.mubr.f32.mxu1 %v158_v61  ;;  %v186_v59 = vld [vmem:[#allocation2 + $0xa8] sm:$0xff] }
  0x74   :  { %354 = vmatmul.mubr.f32.gmra.mrb[24].mxu0 %v125_v0  ;;  %434 = vmatmul.mubr.f32.gmra.mrb[24].mxu1 %v157_v1 }
  0x75   :  { %358 = vmatprep.mubr.f32.mxu0 %v128_v2  ;;  %438 = vmatprep.mubr.f32.mxu1 %v160_v3  ;;  %v171_v2 = vld [vmem:[#allocation2 + $0x30] sm:$0xff] }
  0x76   :  { %v187_v3 = vld [vmem:[#allocation2 + $0xb0] sm:$0xff] }
  0x78   :  { %359 = vmatmul.mubr.f32.gmra.mrb[26].mxu0 %v127_v6  ;;  %439 = vmatmul.mubr.f32.gmra.mrb[26].mxu1 %v159_v7 }
  0x79   :  { %363 = vmatprep.mubr.f32.mxu0 %v130_v8  ;;  %443 = vmatprep.mubr.f32.mxu1 %v162_v9 }
  0x7c   :  { %364 = vmatmul.mubr.f32.gmra.mrb[28].mxu0 %v129_v12  ;;  %444 = vmatmul.mubr.f32.gmra.mrb[28].mxu1 %v161_v13 }
  0x7d   :  { %368 = vmatprep.mubr.f32.mxu0 %v132_v14  ;;  %448 = vmatprep.mubr.f32.mxu1 %v164_v15 }
  0x80   :  { %369 = vmatmul.mubr.f32.gmra.mrb[30].mxu0 %v131_v16  ;;  %449 = vmatmul.mubr.f32.gmra.mrb[30].mxu1 %v163_v17 }
 0x117   :  { %v295_v20 = vpop.f32.mrb[0].mxu0  ;;  %v375_v21 = vpop.f32.mrb[0].mxu1 }
 0x118   :  { %v454_v22 = vadd.f32 %v295_v20, %v165_v18  ;;  %v470_v23 = vadd.f32 %v375_v21, %v181_v19  ;;  %v297_v24 = vpop.f32.mrb[1].mxu0  ;;  %v377_v25 = vpop.f32.mrb[1].mxu1  ;;  %v173_v18 = vld [vmem:[#allocation2 + $0x40] sm:$0xff] }
 0x119   :  { %v189_v19 = vld [vmem:[#allocation2 + $0xc0] sm:$0xff] }
 0x11a   :  { %486 = vst [vmem:[#allocation2] sm:$0xff] %v454_v22  ;;  %502 = vst [vmem:[#allocation2 + $0x80] sm:$0xff] %v470_v23 }
 0x11b   :  { %v300_v28 = vpop.f32.mrb[2].mxu0  ;;  %v380_v29 = vpop.f32.mrb[2].mxu1 }
 0x11c   :  { %v455_v30 = vadd.f32 %v300_v28, %v166_v26  ;;  %v471_v31 = vadd.f32 %v380_v29, %v182_v27  ;;  %v302_v32 = vpop.f32.mrb[3].mxu0  ;;  %v382_v33 = vpop.f32.mrb[3].mxu1  ;;  %v174_v26 = vld [vmem:[#allocation2 + $0x48] sm:$0xff] }
 0x11d   :  { %v190_v27 = vld [vmem:[#allocation2 + $0xc8] sm:$0xff] }
 0x11e   :  { %487 = vst [vmem:[#allocation2 + $0x8] sm:$0xff] %v455_v30  ;;  %503 = vst [vmem:[#allocation2 + $0x88] sm:$0xff] %v471_v31 }
 0x11f   :  { %v305_v36 = vpop.f32.mrb[4].mxu0  ;;  %v385_v37 = vpop.f32.mrb[4].mxu1 }
 0x120   :  { %v456_v38 = vadd.f32 %v305_v36, %v167_v34  ;;  %v472_v39 = vadd.f32 %v385_v37, %v183_v35  ;;  %v307_v40 = vpop.f32.mrb[5].mxu0  ;;  %v387_v41 = vpop.f32.mrb[5].mxu1  ;;  %v175_v34 = vld [vmem:[#allocation2 + $0x50] sm:$0xff] }
 0x121   :  { %v191_v35 = vld [vmem:[#allocation2 + $0xd0] sm:$0xff] }
 0x122   :  { %488 = vst [vmem:[#allocation2 + $0x10] sm:$0xff] %v456_v38  ;;  %504 = vst [vmem:[#allocation2 + $0x90] sm:$0xff] %v472_v39 }
 0x123   :  { %v310_v44 = vpop.f32.mrb[6].mxu0  ;;  %v390_v45 = vpop.f32.mrb[6].mxu1 }
 0x124   :  { %v457_v46 = vadd.f32 %v310_v44, %v168_v42  ;;  %v473_v47 = vadd.f32 %v390_v45, %v184_v43  ;;  %v312_v48 = vpop.f32.mrb[7].mxu0  ;;  %v392_v49 = vpop.f32.mrb[7].mxu1  ;;  %v176_v42 = vld [vmem:[#allocation2 + $0x58] sm:$0xff] }
 0x125   :  { %v192_v43 = vld [vmem:[#allocation2 + $0xd8] sm:$0xff] }
 0x126   :  { %489 = vst [vmem:[#allocation2 + $0x18] sm:$0xff] %v457_v46  ;;  %505 = vst [vmem:[#allocation2 + $0x98] sm:$0xff] %v473_v47 }
 0x127   :  { %v315_v52 = vpop.f32.mrb[8].mxu0  ;;  %v395_v53 = vpop.f32.mrb[8].mxu1 }
 0x128   :  { %v458_v54 = vadd.f32 %v315_v52, %v169_v50  ;;  %v474_v55 = vadd.f32 %v395_v53, %v185_v51  ;;  %v317_v56 = vpop.f32.mrb[9].mxu0  ;;  %v397_v57 = vpop.f32.mrb[9].mxu1  ;;  %v177_v50 = vld [vmem:[#allocation2 + $0x60] sm:$0xff] }
 0x129   :  { %v193_v51 = vld [vmem:[#allocation2 + $0xe0] sm:$0xff] }
 0x12a   :  { %490 = vst [vmem:[#allocation2 + $0x20] sm:$0xff] %v458_v54  ;;  %506 = vst [vmem:[#allocation2 + $0xa0] sm:$0xff] %v474_v55 }
 0x12b   :  { %v320_v60 = vpop.f32.mrb[10].mxu0  ;;  %v400_v61 = vpop.f32.mrb[10].mxu1 }
 0x12c   :  { %v459_v62 = vadd.f32 %v320_v60, %v170_v58  ;;  %v475_v63 = vadd.f32 %v400_v61, %v186_v59  ;;  %v322_v0 = vpop.f32.mrb[11].mxu0  ;;  %v402_v1 = vpop.f32.mrb[11].mxu1  ;;  %v178_v58 = vld [vmem:[#allocation2 + $0x68] sm:$0xff] }
 0x12d   :  { %v194_v59 = vld [vmem:[#allocation2 + $0xe8] sm:$0xff] }
 0x12e   :  { %491 = vst [vmem:[#allocation2 + $0x28] sm:$0xff] %v459_v62  ;;  %507 = vst [vmem:[#allocation2 + $0xa8] sm:$0xff] %v475_v63 }
 0x12f   :  { %v325_v4 = vpop.f32.mrb[12].mxu0  ;;  %v405_v5 = vpop.f32.mrb[12].mxu1 }
 0x130   :  { %v460_v6 = vadd.f32 %v325_v4, %v171_v2  ;;  %v476_v7 = vadd.f32 %v405_v5, %v187_v3  ;;  %v327_v8 = vpop.f32.mrb[13].mxu0  ;;  %v407_v9 = vpop.f32.mrb[13].mxu1  ;;  %v179_v2 = vld [vmem:[#allocation2 + $0x70] sm:$0xff] }
 0x131   :  { %v195_v3 = vld [vmem:[#allocation2 + $0xf0] sm:$0xff] }
 0x132   :  { %492 = vst [vmem:[#allocation2 + $0x30] sm:$0xff] %v460_v6  ;;  %508 = vst [vmem:[#allocation2 + $0xb0] sm:$0xff] %v476_v7 }
 0x133   :  { %v330_v12 = vpop.f32.mrb[14].mxu0  ;;  %v410_v13 = vpop.f32.mrb[14].mxu1 }
 0x134   :  { %v461_v14 = vadd.f32 %v330_v12, %v172_v10  ;;  %v477_v15 = vadd.f32 %v410_v13, %v188_v11  ;;  %v332_v16 = vpop.f32.mrb[15].mxu0  ;;  %v412_v17 = vpop.f32.mrb[15].mxu1  ;;  %v180_v10 = vld [vmem:[#allocation2 + $0x78] sm:$0xff] }
 0x135   :  { %v196_v11 = vld [vmem:[#allocation2 + $0xf8] sm:$0xff] }
 0x136   :  { %493 = vst [vmem:[#allocation2 + $0x38] sm:$0xff] %v461_v14  ;;  %509 = vst [vmem:[#allocation2 + $0xb8] sm:$0xff] %v477_v15 }
 0x137   :  { %v335_v20 = vpop.f32.mrb[16].mxu0  ;;  %v415_v21 = vpop.f32.mrb[16].mxu1 }
 0x138   :  { %v462_v22 = vadd.f32 %v335_v20, %v173_v18  ;;  %v478_v23 = vadd.f32 %v415_v21, %v189_v19  ;;  %v337_v24 = vpop.f32.mrb[17].mxu0  ;;  %v417_v25 = vpop.f32.mrb[17].mxu1 }
 0x13a   :  { %494 = vst [vmem:[#allocation2 + $0x40] sm:$0xff] %v462_v22  ;;  %510 = vst [vmem:[#allocation2 + $0xc0] sm:$0xff] %v478_v23 }
 0x13b   :  { %v340_v28 = vpop.f32.mrb[18].mxu0  ;;  %v420_v29 = vpop.f32.mrb[18].mxu1 }
 0x13c   :  { %v463_v30 = vadd.f32 %v340_v28, %v174_v26  ;;  %v479_v31 = vadd.f32 %v420_v29, %v190_v27  ;;  %v342_v32 = vpop.f32.mrb[19].mxu0  ;;  %v422_v33 = vpop.f32.mrb[19].mxu1 }
 0x13e   :  { %495 = vst [vmem:[#allocation2 + $0x48] sm:$0xff] %v463_v30  ;;  %511 = vst [vmem:[#allocation2 + $0xc8] sm:$0xff] %v479_v31 }
 0x13f   :  { %v345_v36 = vpop.f32.mrb[20].mxu0  ;;  %v425_v37 = vpop.f32.mrb[20].mxu1 }
 0x140   :  { %v464_v38 = vadd.f32 %v345_v36, %v175_v34  ;;  %v480_v39 = vadd.f32 %v425_v37, %v191_v35  ;;  %v347_v40 = vpop.f32.mrb[21].mxu0  ;;  %v427_v41 = vpop.f32.mrb[21].mxu1 }
 0x142   :  { %496 = vst [vmem:[#allocation2 + $0x50] sm:$0xff] %v464_v38  ;;  %512 = vst [vmem:[#allocation2 + $0xd0] sm:$0xff] %v480_v39 }
 0x143   :  { %v350_v44 = vpop.f32.mrb[22].mxu0  ;;  %v430_v45 = vpop.f32.mrb[22].mxu1 }
 0x144   :  { %v465_v46 = vadd.f32 %v350_v44, %v176_v42  ;;  %v481_v47 = vadd.f32 %v430_v45, %v192_v43  ;;  %v352_v48 = vpop.f32.mrb[23].mxu0  ;;  %v432_v49 = vpop.f32.mrb[23].mxu1 }
 0x146   :  { %497 = vst [vmem:[#allocation2 + $0x58] sm:$0xff] %v465_v46  ;;  %513 = vst [vmem:[#allocation2 + $0xd8] sm:$0xff] %v481_v47 }
 0x147   :  { %v355_v52 = vpop.f32.mrb[24].mxu0  ;;  %v435_v53 = vpop.f32.mrb[24].mxu1 }
 0x148   :  { %v466_v54 = vadd.f32 %v355_v52, %v177_v50  ;;  %v482_v55 = vadd.f32 %v435_v53, %v193_v51  ;;  %v357_v56 = vpop.f32.mrb[25].mxu0  ;;  %v437_v57 = vpop.f32.mrb[25].mxu1 }
 0x14a   :  { %498 = vst [vmem:[#allocation2 + $0x60] sm:$0xff] %v466_v54  ;;  %514 = vst [vmem:[#allocation2 + $0xe0] sm:$0xff] %v482_v55 }
 0x14b   :  { %v360_v60 = vpop.f32.mrb[26].mxu0  ;;  %v440_v61 = vpop.f32.mrb[26].mxu1 }
 0x14c   :  { %v467_v62 = vadd.f32 %v360_v60, %v178_v58  ;;  %v483_v63 = vadd.f32 %v440_v61, %v194_v59  ;;  %v362_v0 = vpop.f32.mrb[27].mxu0  ;;  %v442_v1 = vpop.f32.mrb[27].mxu1 }
 0x14e   :  { %499 = vst [vmem:[#allocation2 + $0x68] sm:$0xff] %v467_v62  ;;  %515 = vst [vmem:[#allocation2 + $0xe8] sm:$0xff] %v483_v63 }
 0x14f   :  { %v365_v4 = vpop.f32.mrb[28].mxu0  ;;  %v445_v5 = vpop.f32.mrb[28].mxu1 }
 0x150   :  { %v468_v6 = vadd.f32 %v365_v4, %v179_v2  ;;  %v484_v7 = vadd.f32 %v445_v5, %v195_v3  ;;  %v367_v8 = vpop.f32.mrb[29].mxu0  ;;  %v447_v9 = vpop.f32.mrb[29].mxu1 }
 0x152   :  { %500 = vst [vmem:[#allocation2 + $0x70] sm:$0xff] %v468_v6  ;;  %516 = vst [vmem:[#allocation2 + $0xf0] sm:$0xff] %v484_v7 }
 0x153   :  { %v370_v12 = vpop.f32.mrb[30].mxu0  ;;  %v450_v13 = vpop.f32.mrb[30].mxu1 }
 0x154   :  { %v469_v14 = vadd.f32 %v370_v12, %v180_v10  ;;  %v485_v15 = vadd.f32 %v450_v13, %v196_v11  ;;  %v372_v16 = vpop.f32.mrb[31].mxu0  ;;  %v452_v17 = vpop.f32.mrb[31].mxu1 }
 0x156   :  { %501 = vst [vmem:[#allocation2 + $0x78] sm:$0xff] %v469_v14  ;;  %517 = vst [vmem:[#allocation2 + $0xf8] sm:$0xff] %v485_v15 }
 0x157 PF:  { %v553_v18 = vld [vmem:[%s2100_s3] sm:$0xff]  ;;  %v554_v19 = vld [vmem:[%s2100_s3 + $0x8] sm:$0xff]  ;;  %v555_v20 = vld [vmem:[%s2100_s3 + $0x10] sm:$0xff] }
 0x158   :  { %v1456_v21 = vpack.c.bf16 %v554_v19, %v553_v18  ;;  %v556_v22 = vld [vmem:[%s2100_s3 + $0x18] sm:$0xff]  ;;  %v557_v24 = vld [vmem:[%s2100_s3 + $0x20] sm:$0xff]  ;;  %v558_v25 = vld [vmem:[%s2100_s3 + $0x28] sm:$0xff] }
 0x159   :  { %v1460_v23 = vpack.c.bf16 %v556_v22, %v555_v20  ;;  %v1464_v26 = vpack.c.bf16 %v558_v25, %v557_v24  ;;  %v521_v27 = vld [vmem:[#allocation2] sm:$0xff]  ;;  %v559_v28 = vld [vmem:[%s2100_s3 + $0x30] sm:$0xff]  ;;  %v560_v29 = vld [vmem:[%s2100_s3 + $0x38] sm:$0xff] }
 0x15a   :  { %1457 = vmatprep.subr.bf16.mxu0 %v1456_v21  ;;  %1280 = vmatprep.mubr.f32.mxu0 %v521_v27  ;;  %v1468_v30 = vpack.c.bf16 %v560_v29, %v559_v28  ;;  %v561_v31 = vld [vmem:[%s2100_s3 + $0x40] sm:$0xff]  ;;  %v562_v32 = vld [vmem:[%s2100_s3 + $0x48] sm:$0xff]  ;;  %v563_v34 = vld [vmem:[%s2100_s3 + $0x50] sm:$0xff] }
 0x15b   :  { %1459 = vmatpush3.bf16.msra.mxu0 %v1456_v21  ;;  %v1472_v33 = vpack.c.bf16 %v562_v32, %v561_v31  ;;  %v564_v35 = vld [vmem:[%s2100_s3 + $0x58] sm:$0xff]  ;;  %v833_v36 = vld [vmem:[%s2102_s5] sm:$0xff]  ;;  %v834_v37 = vld [vmem:[%s2102_s5 + $0x8] sm:$0xff] }
 0x15c   :  { %1461 = vmatprep.subr.bf16.mxu0 %v1460_v23  ;;  %v835_v38 = vld [vmem:[%s2102_s5 + $0x10] sm:$0xff]  ;;  %v1476_v39 = vpack.c.bf16 %v564_v35, %v563_v34  ;;  %v565_v40 = vld [vmem:[%s2100_s3 + $0x60] sm:$0xff]  ;;  %v1488_v41 = vpack.c.bf16 %v834_v37, %v833_v36  ;;  %v836_v42 = vld [vmem:[%s2102_s5 + $0x18] sm:$0xff] }
 0x15d   :  { %v566_v43 = vld [vmem:[%s2100_s3 + $0x68] sm:$0xff]  ;;  %v1492_v44 = vpack.c.bf16 %v836_v42, %v835_v38  ;;  %v837_v45 = vld [vmem:[%s2102_s5 + $0x20] sm:$0xff]  ;;  %v567_v48 = vld [vmem:[%s2100_s3 + $0x70] sm:$0xff] }
 0x15e   :  { %v838_v46 = vld [vmem:[%s2102_s5 + $0x28] sm:$0xff]  ;;  %1489 = vmatprep.subr.bf16.mxu1 %v1488_v41  ;;  %v1480_v47 = vpack.c.bf16 %v566_v43, %v565_v40  ;;  %v568_v50 = vld [vmem:[%s2100_s3 + $0x78] sm:$0xff]  ;;  %v839_v51 = vld [vmem:[%s2102_s5 + $0x30] sm:$0xff] }
 0x15f   :  { %1463 = vmatpush3.bf16.msra.mxu0 %v1460_v23  ;;  %1491 = vmatpush3.bf16.msra.mxu1 %v1488_v41  ;;  %v1496_v49 = vpack.c.bf16 %v838_v46, %v837_v45  ;;  %v840_v52 = vld [vmem:[%s2102_s5 + $0x38] sm:$0xff]  ;;  %v1484_v53 = vpack.c.bf16 %v568_v50, %v567_v48  ;;  %v841_v55 = vld [vmem:[%s2102_s5 + $0x40] sm:$0xff]  ;;  %v842_v56 = vld [vmem:[%s2102_s5 + $0x48] sm:$0xff] }
 0x160   :  { %1465 = vmatprep.subr.bf16.mxu0 %v1464_v26  ;;  %1493 = vmatprep.subr.bf16.mxu1 %v1492_v44  ;;  %v1500_v54 = vpack.c.bf16 %v840_v52, %v839_v51  ;;  %v1504_v57 = vpack.c.bf16 %v842_v56, %v841_v55  ;;  %v843_v58 = vld [vmem:[%s2102_s5 + $0x50] sm:$0xff]  ;;  %v844_v59 = vld [vmem:[%s2102_s5 + $0x58] sm:$0xff]  ;;  %v522_v60 = vld [vmem:[#allocation2 + $0x8] sm:$0xff] }
 0x161   :  { %v523_v61 = vld [vmem:[#allocation2 + $0x10] sm:$0xff]  ;;  %v1508_v62 = vpack.c.bf16 %v844_v59, %v843_v58  ;;  %v845_v63 = vld [vmem:[%s2102_s5 + $0x60] sm:$0xff]  ;;  %v846_v0 = vld [vmem:[%s2102_s5 + $0x68] sm:$0xff] }
 0x162   :  { %v524_v1 = vld [vmem:[#allocation2 + $0x18] sm:$0xff]  ;;  %v525_v2 = vld [vmem:[#allocation2 + $0x20] sm:$0xff]  ;;  %v1512_v3 = vpack.c.bf16 %v846_v0, %v845_v63  ;;  %v526_v4 = vld [vmem:[#allocation2 + $0x28] sm:$0xff] }
 0x163   :  { %1467 = vmatpush3.bf16.msra.mxu0 %v1464_v26  ;;  %1495 = vmatpush3.bf16.msra.mxu1 %v1492_v44  ;;  %v527_v5 = vld [vmem:[#allocation2 + $0x30] sm:$0xff]  ;;  %v528_v6 = vld [vmem:[#allocation2 + $0x38] sm:$0xff]  ;;  %v529_v7 = vld [vmem:[#allocation2 + $0x40] sm:$0xff] }
 0x164   :  { %1469 = vmatprep.subr.bf16.mxu0 %v1468_v30  ;;  %1497 = vmatprep.subr.bf16.mxu1 %v1496_v49  ;;  %v530_v8 = vld [vmem:[#allocation2 + $0x48] sm:$0xff]  ;;  %v531_v9 = vld [vmem:[#allocation2 + $0x50] sm:$0xff]  ;;  %v532_v10 = vld [vmem:[#allocation2 + $0x58] sm:$0xff] }
 0x165   :  { %v533_v11 = vld [vmem:[#allocation2 + $0x60] sm:$0xff]  ;;  %v534_v12 = vld [vmem:[#allocation2 + $0x68] sm:$0xff]  ;;  %v535_v13 = vld [vmem:[#allocation2 + $0x70] sm:$0xff] }
 0x166   :  { %v536_v14 = vld [vmem:[#allocation2 + $0x78] sm:$0xff]  ;;  %v537_v15 = vld [vmem:[#allocation2 + $0x80] sm:$0xff]  ;;  %v538_v16 = vld [vmem:[#allocation2 + $0x88] sm:$0xff] }
 0x167   :  { %1471 = vmatpush3.bf16.msra.mxu0 %v1468_v30  ;;  %1499 = vmatpush3.bf16.msra.mxu1 %v1496_v49  ;;  %v539_v17 = vld [vmem:[#allocation2 + $0x90] sm:$0xff]  ;;  %v540_v18 = vld [vmem:[#allocation2 + $0x98] sm:$0xff]  ;;  %v541_v19 = vld [vmem:[#allocation2 + $0xa0] sm:$0xff] }
 0x168   :  { %1473 = vmatprep.subr.bf16.mxu0 %v1472_v33  ;;  %1501 = vmatprep.subr.bf16.mxu1 %v1500_v54  ;;  %v542_v20 = vld [vmem:[#allocation2 + $0xa8] sm:$0xff]  ;;  %v543_v21 = vld [vmem:[#allocation2 + $0xb0] sm:$0xff]  ;;  %v544_v22 = vld [vmem:[#allocation2 + $0xb8] sm:$0xff] }
 0x169   :  { %v545_v23 = vld [vmem:[#allocation2 + $0xc0] sm:$0xff]  ;;  %v546_v24 = vld [vmem:[#allocation2 + $0xc8] sm:$0xff]  ;;  %v547_v25 = vld [vmem:[#allocation2 + $0xd0] sm:$0xff] }
 0x16a   :  { %v548_v26 = vld [vmem:[#allocation2 + $0xd8] sm:$0xff]  ;;  %v549_v27 = vld [vmem:[#allocation2 + $0xe0] sm:$0xff]  ;;  %v550_v28 = vld [vmem:[#allocation2 + $0xe8] sm:$0xff] }
 0x16b   :  { %1475 = vmatpush3.bf16.msra.mxu0 %v1472_v33  ;;  %1503 = vmatpush3.bf16.msra.mxu1 %v1500_v54  ;;  %v551_v29 = vld [vmem:[#allocation2 + $0xf0] sm:$0xff]  ;;  %v552_v30 = vld [vmem:[#allocation2 + $0xf8] sm:$0xff]  ;;  %v1930_v34 = vld [vmem:[%s2101_s4] ss:$0 sm:$0xff] }
 0x16c   :  { %1477 = vmatprep.subr.bf16.mxu0 %v1476_v39  ;;  %1505 = vmatprep.subr.bf16.mxu1 %v1504_v57  ;;  %v847_v31 = vld [vmem:[%s2102_s5 + $0x70] sm:$0xff]  ;;  %v848_v32 = vld [vmem:[%s2102_s5 + $0x78] sm:$0xff] }
 0x16d   :  { %v1516_v33 = vpack.c.bf16 %v848_v32, %v847_v31 }
 0x16f   :  { %1479 = vmatpush3.bf16.msra.mxu0 %v1476_v39  ;;  %1507 = vmatpush3.bf16.msra.mxu1 %v1504_v57 }
 0x170   :  { %1481 = vmatprep.subr.bf16.mxu0 %v1480_v47  ;;  %1509 = vmatprep.subr.bf16.mxu1 %v1508_v62 }
 0x173   :  { %1483 = vmatpush3.bf16.msra.mxu0 %v1480_v47  ;;  %1511 = vmatpush3.bf16.msra.mxu1 %v1508_v62 }
 0x174   :  { %1485 = vmatprep.subr.bf16.mxu0 %v1484_v53  ;;  %1513 = vmatprep.subr.bf16.mxu1 %v1512_v3 }
 0x177   :  { %1487 = vmatpush3.bf16.msra.mxu0 %v1484_v53  ;;  %1515 = vmatpush3.bf16.msra.mxu1 %v1512_v3 }
 0x178   :  { %1517 = vmatprep.subr.bf16.mxu1 %v1516_v33 }
 0x17a   :  { %1281 = vmatmul.mubr.f32.vlgmr.msra.gmra.mrb[0].mxu0 %v522_v60 }
 0x17b   :  { %1283 = vmatprep.mubr.f32.mxu0 %v523_v61  ;;  %1519 = vmatpush3.bf16.msra.mxu1 %v1516_v33 }
 0x17e   :  { %1284 = vmatmul.mubr.f32.gmra.mrb[2].mxu0 %v524_v1 }
 0x17f   :  { %1286 = vmatprep.mubr.f32.mxu0 %v525_v2 }
 0x182   :  { %1287 = vmatmul.mubr.f32.gmra.mrb[4].mxu0 %v526_v4 }
 0x183   :  { %1289 = vmatprep.mubr.f32.mxu0 %v527_v5 }
 0x186   :  { %1290 = vmatmul.mubr.f32.gmra.mrb[6].mxu0 %v528_v6 }
 0x187   :  { %1292 = vmatprep.mubr.f32.mxu0 %v529_v7 }
 0x18a   :  { %1293 = vmatmul.mubr.f32.gmra.mrb[8].mxu0 %v530_v8 }
 0x18b   :  { %1295 = vmatprep.mubr.f32.mxu0 %v531_v9 }
 0x18e   :  { %1296 = vmatmul.mubr.f32.gmra.mrb[10].mxu0 %v532_v10 }
 0x18f   :  { %1298 = vmatprep.mubr.f32.mxu0 %v533_v11 }
 0x192   :  { %1299 = vmatmul.mubr.f32.gmra.mrb[12].mxu0 %v534_v12 }
 0x193   :  { %1301 = vmatprep.mubr.f32.mxu0 %v535_v13 }
 0x196   :  { %1302 = vmatmul.mubr.f32.gmra.mrb[14].mxu0 %v536_v14 }
 0x197   :  { %1304 = vmatprep.mubr.f32.mxu0 %v537_v15 }
 0x19a   :  { %1305 = vmatmul.mubr.f32.gmra.mrb[16].mxu0 %v538_v16 }
 0x19b   :  { %1307 = vmatprep.mubr.f32.mxu0 %v539_v17 }
 0x19e   :  { %1308 = vmatmul.mubr.f32.gmra.mrb[18].mxu0 %v540_v18 }
 0x19f   :  { %1310 = vmatprep.mubr.f32.mxu0 %v541_v19 }
 0x1a2   :  { %1311 = vmatmul.mubr.f32.gmra.mrb[20].mxu0 %v542_v20 }
 0x1a3   :  { %1313 = vmatprep.mubr.f32.mxu0 %v543_v21 }
 0x1a6   :  { %1314 = vmatmul.mubr.f32.gmra.mrb[22].mxu0 %v544_v22 }
 0x1a7   :  { %1316 = vmatprep.mubr.f32.mxu0 %v545_v23 }
 0x1aa   :  { %1317 = vmatmul.mubr.f32.gmra.mrb[24].mxu0 %v546_v24 }
 0x1ab   :  { %1319 = vmatprep.mubr.f32.mxu0 %v547_v25 }
 0x1ae   :  { %1320 = vmatmul.mubr.f32.gmra.mrb[26].mxu0 %v548_v26 }
 0x1af   :  { %1322 = vmatprep.mubr.f32.mxu0 %v549_v27 }
 0x1b2   :  { %1323 = vmatmul.mubr.f32.gmra.mrb[28].mxu0 %v550_v28 }
 0x1b3   :  { %1325 = vmatprep.mubr.f32.mxu0 %v551_v29 }
 0x1b6   :  { %1326 = vmatmul.mubr.f32.gmra.mrb[30].mxu0 %v552_v30 }
 0x24d   :  { %v1282_v35 = vpop.f32.mrb[0].mxu0 }
 0x24e   :  { %v648_v36 = vadd.f32 %v1282_v35, %v1930_v34  ;;  %v642_v37 = vpop.f32.mrb[1].mxu0 }
 0x24f   :  { %v643_v38 = vadd.f32 %v1930_v34, %v642_v37 }
 0x250   :  { %v802_v41 = vmax.f32 %v648_v36, 0.0 }
 0x251   :  { %v1285_v39 = vpop.f32.mrb[2].mxu0  ;;  %v801_v40 = vmax.f32 %v643_v38, 0.0 }
 0x252   :  { %v658_v42 = vadd.f32 %v1285_v39, %v1930_v34  ;;  %v652_v43 = vpop.f32.mrb[3].mxu0 }
 0x253   :  { %v653_v44 = vadd.f32 %v1930_v34, %v652_v43  ;;  %1360 = vmatprep.mubr.f32.mxu1 %v801_v40 }
 0x254   :  { %1361 = vmatmul.mubr.f32.vlgmr.msra.gmra.mrb[0].mxu1 %v802_v41  ;;  %v804_v47 = vmax.f32 %v658_v42, 0.0 }
 0x255   :  { %v803_v45 = vmax.f32 %v653_v44, 0.0  ;;  %v1288_v46 = vpop.f32.mrb[4].mxu0 }
 0x256   :  { %v668_v48 = vadd.f32 %v1288_v46, %v1930_v34  ;;  %v662_v49 = vpop.f32.mrb[5].mxu0 }
 0x257   :  { %v663_v50 = vadd.f32 %v1930_v34, %v662_v49  ;;  %1363 = vmatprep.mubr.f32.mxu1 %v803_v45 }
 0x258   :  { %1364 = vmatmul.mubr.f32.gmra.mrb[2].mxu1 %v804_v47  ;;  %v806_v53 = vmax.f32 %v668_v48, 0.0 }
 0x259   :  { %v805_v51 = vmax.f32 %v663_v50, 0.0  ;;  %v1291_v52 = vpop.f32.mrb[6].mxu0 }
 0x25a   :  { %v678_v54 = vadd.f32 %v1291_v52, %v1930_v34  ;;  %v672_v55 = vpop.f32.mrb[7].mxu0 }
 0x25b   :  { %v673_v56 = vadd.f32 %v1930_v34, %v672_v55  ;;  %1366 = vmatprep.mubr.f32.mxu1 %v805_v51 }
 0x25c   :  { %1367 = vmatmul.mubr.f32.gmra.mrb[4].mxu1 %v806_v53  ;;  %v808_v59 = vmax.f32 %v678_v54, 0.0 }
 0x25d   :  { %v807_v57 = vmax.f32 %v673_v56, 0.0  ;;  %v1294_v58 = vpop.f32.mrb[8].mxu0 }
 0x25e   :  { %v688_v60 = vadd.f32 %v1294_v58, %v1930_v34  ;;  %v682_v61 = vpop.f32.mrb[9].mxu0 }
 0x25f   :  { %v683_v62 = vadd.f32 %v1930_v34, %v682_v61  ;;  %1369 = vmatprep.mubr.f32.mxu1 %v807_v57 }
 0x260   :  { %1370 = vmatmul.mubr.f32.gmra.mrb[6].mxu1 %v808_v59  ;;  %v810_v1 = vmax.f32 %v688_v60, 0.0 }
 0x261   :  { %v809_v63 = vmax.f32 %v683_v62, 0.0  ;;  %v1297_v0 = vpop.f32.mrb[10].mxu0 }
 0x262   :  { %v698_v2 = vadd.f32 %v1297_v0, %v1930_v34  ;;  %v692_v3 = vpop.f32.mrb[11].mxu0 }
 0x263   :  { %v693_v4 = vadd.f32 %v1930_v34, %v692_v3  ;;  %1372 = vmatprep.mubr.f32.mxu1 %v809_v63 }
 0x264   :  { %1373 = vmatmul.mubr.f32.gmra.mrb[8].mxu1 %v810_v1  ;;  %v812_v7 = vmax.f32 %v698_v2, 0.0 }
 0x265   :  { %v811_v5 = vmax.f32 %v693_v4, 0.0  ;;  %v1300_v6 = vpop.f32.mrb[12].mxu0  ;;  %v1967_v4 = vld [vmem:[%s2103_s6] ss:$0 sm:$0xff] }
 0x266   :  { %v708_v8 = vadd.f32 %v1300_v6, %v1930_v34  ;;  %v702_v9 = vpop.f32.mrb[13].mxu0 }
 0x267   :  { %v703_v10 = vadd.f32 %v1930_v34, %v702_v9  ;;  %1375 = vmatprep.mubr.f32.mxu1 %v811_v5 }
 0x268   :  { %1376 = vmatmul.mubr.f32.gmra.mrb[10].mxu1 %v812_v7  ;;  %v814_v13 = vmax.f32 %v708_v8, 0.0 }
 0x269   :  { %v813_v11 = vmax.f32 %v703_v10, 0.0  ;;  %v1303_v12 = vpop.f32.mrb[14].mxu0 }
 0x26a   :  { %v718_v14 = vadd.f32 %v1303_v12, %v1930_v34  ;;  %v712_v15 = vpop.f32.mrb[15].mxu0 }
 0x26b   :  { %v713_v16 = vadd.f32 %v1930_v34, %v712_v15  ;;  %1378 = vmatprep.mubr.f32.mxu1 %v813_v11 }
 0x26c   :  { %1379 = vmatmul.mubr.f32.gmra.mrb[12].mxu1 %v814_v13  ;;  %v816_v19 = vmax.f32 %v718_v14, 0.0 }
 0x26d   :  { %v815_v17 = vmax.f32 %v713_v16, 0.0  ;;  %v1306_v18 = vpop.f32.mrb[16].mxu0 }
 0x26e   :  { %v728_v20 = vadd.f32 %v1306_v18, %v1930_v34  ;;  %v722_v21 = vpop.f32.mrb[17].mxu0 }
 0x26f   :  { %v723_v22 = vadd.f32 %v1930_v34, %v722_v21  ;;  %1381 = vmatprep.mubr.f32.mxu1 %v815_v17 }
 0x270   :  { %1382 = vmatmul.mubr.f32.gmra.mrb[14].mxu1 %v816_v19  ;;  %v818_v25 = vmax.f32 %v728_v20, 0.0 }
 0x271   :  { %v817_v23 = vmax.f32 %v723_v22, 0.0  ;;  %v1309_v24 = vpop.f32.mrb[18].mxu0 }
 0x272   :  { %v738_v26 = vadd.f32 %v1309_v24, %v1930_v34  ;;  %v732_v27 = vpop.f32.mrb[19].mxu0 }
 0x273   :  { %v733_v28 = vadd.f32 %v1930_v34, %v732_v27  ;;  %1384 = vmatprep.mubr.f32.mxu1 %v817_v23 }
 0x274   :  { %1385 = vmatmul.mubr.f32.gmra.mrb[16].mxu1 %v818_v25  ;;  %v820_v31 = vmax.f32 %v738_v26, 0.0 }
 0x275   :  { %v819_v29 = vmax.f32 %v733_v28, 0.0  ;;  %v1312_v30 = vpop.f32.mrb[20].mxu0 }
 0x276   :  { %v748_v32 = vadd.f32 %v1312_v30, %v1930_v34  ;;  %v742_v33 = vpop.f32.mrb[21].mxu0 }
 0x277   :  { %v743_v35 = vadd.f32 %v1930_v34, %v742_v33  ;;  %1387 = vmatprep.mubr.f32.mxu1 %v819_v29 }
 0x278   :  { %1388 = vmatmul.mubr.f32.gmra.mrb[18].mxu1 %v820_v31  ;;  %v822_v38 = vmax.f32 %v748_v32, 0.0 }
 0x279   :  { %v821_v36 = vmax.f32 %v743_v35, 0.0  ;;  %v1315_v37 = vpop.f32.mrb[22].mxu0 }
 0x27a   :  { %v758_v39 = vadd.f32 %v1315_v37, %v1930_v34  ;;  %v752_v40 = vpop.f32.mrb[23].mxu0 }
 0x27b   :  { %v753_v41 = vadd.f32 %v1930_v34, %v752_v40  ;;  %1390 = vmatprep.mubr.f32.mxu1 %v821_v36 }
 0x27c   :  { %1391 = vmatmul.mubr.f32.gmra.mrb[20].mxu1 %v822_v38  ;;  %v824_v44 = vmax.f32 %v758_v39, 0.0 }
 0x27d   :  { %v823_v42 = vmax.f32 %v753_v41, 0.0  ;;  %v1318_v43 = vpop.f32.mrb[24].mxu0 }
 0x27e   :  { %v768_v45 = vadd.f32 %v1318_v43, %v1930_v34  ;;  %v762_v46 = vpop.f32.mrb[25].mxu0 }
 0x27f   :  { %v763_v47 = vadd.f32 %v1930_v34, %v762_v46  ;;  %1393 = vmatprep.mubr.f32.mxu1 %v823_v42 }
 0x280   :  { %1394 = vmatmul.mubr.f32.gmra.mrb[22].mxu1 %v824_v44  ;;  %v826_v50 = vmax.f32 %v768_v45, 0.0 }
 0x281   :  { %v825_v48 = vmax.f32 %v763_v47, 0.0  ;;  %v1321_v49 = vpop.f32.mrb[26].mxu0 }
 0x282   :  { %v778_v51 = vadd.f32 %v1321_v49, %v1930_v34  ;;  %v772_v52 = vpop.f32.mrb[27].mxu0 }
 0x283   :  { %v773_v53 = vadd.f32 %v1930_v34, %v772_v52  ;;  %1396 = vmatprep.mubr.f32.mxu1 %v825_v48 }
 0x284   :  { %1397 = vmatmul.mubr.f32.gmra.mrb[24].mxu1 %v826_v50  ;;  %v828_v56 = vmax.f32 %v778_v51, 0.0 }
 0x285   :  { %v827_v54 = vmax.f32 %v773_v53, 0.0  ;;  %v1324_v55 = vpop.f32.mrb[28].mxu0 }
 0x286   :  { %v788_v57 = vadd.f32 %v1324_v55, %v1930_v34  ;;  %v782_v58 = vpop.f32.mrb[29].mxu0 }
 0x287   :  { %v783_v59 = vadd.f32 %v1930_v34, %v782_v58  ;;  %1399 = vmatprep.mubr.f32.mxu1 %v827_v54 }
 0x288   :  { %1400 = vmatmul.mubr.f32.gmra.mrb[26].mxu1 %v828_v56  ;;  %v830_v62 = vmax.f32 %v788_v57, 0.0 }
 0x289   :  { %v829_v60 = vmax.f32 %v783_v59, 0.0  ;;  %v1327_v61 = vpop.f32.mrb[30].mxu0 }
 0x28a   :  { %v798_v63 = vadd.f32 %v1327_v61, %v1930_v34  ;;  %v792_v0 = vpop.f32.mrb[31].mxu0 }
 0x28b   :  { %v793_v1 = vadd.f32 %v1930_v34, %v792_v0  ;;  %1402 = vmatprep.mubr.f32.mxu1 %v829_v60 }
 0x28c   :  { %1403 = vmatmul.mubr.f32.gmra.mrb[28].mxu1 %v830_v62  ;;  %v832_v3 = vmax.f32 %v798_v63, 0.0 }
 0x28d   :  { %v831_v2 = vmax.f32 %v793_v1, 0.0 }
 0x28f   :  { %1405 = vmatprep.mubr.f32.mxu1 %v831_v2 }
 0x290   :  { %1406 = vmatmul.mubr.f32.gmra.mrb[30].mxu1 %v832_v3 }
 0x327   :  { %v1362_v5 = vpop.f32.mrb[0].mxu1 }
 0x328   :  { %v928_v6 = vadd.f32 %v1362_v5, %v1967_v4  ;;  %v922_v7 = vpop.f32.mrb[1].mxu1 }
 0x329   :  { %v923_v8 = vadd.f32 %v1967_v4, %v922_v7 }
 0x32a   :  { %v1082_v9 = vmax.f32 %v928_v6, 0.0 }
 0x32b   :  { %v1081_v10 = vmax.f32 %v923_v8, 0.0  ;;  %v1365_v34 = vpop.f32.mrb[2].mxu1 }
 0x32c   :  { %1114 = vst [vmem:[%s2104_s7 + $0x8] sm:$0xff] %v1082_v9  ;;  %v938_v11 = vadd.f32 %v1365_v34, %v1967_v4  ;;  %v932_v12 = vpop.f32.mrb[3].mxu1 }
 0x32d   :  { %1113 = vst [vmem:[%s2104_s7] sm:$0xff] %v1081_v10  ;;  %v933_v13 = vadd.f32 %v1967_v4, %v932_v12 }
 0x32e   :  { %v1084_v14 = vmax.f32 %v938_v11, 0.0 }
 0x32f   :  { %v1083_v15 = vmax.f32 %v933_v13, 0.0  ;;  %v1368_v16 = vpop.f32.mrb[4].mxu1 }
 0x330   :  { %1116 = vst [vmem:[%s2104_s7 + $0x18] sm:$0xff] %v1084_v14  ;;  %v948_v17 = vadd.f32 %v1368_v16, %v1967_v4  ;;  %v942_v18 = vpop.f32.mrb[5].mxu1 }
 0x331   :  { %1115 = vst [vmem:[%s2104_s7 + $0x10] sm:$0xff] %v1083_v15  ;;  %v943_v19 = vadd.f32 %v1967_v4, %v942_v18 }
 0x332   :  { %v1086_v20 = vmax.f32 %v948_v17, 0.0 }
 0x333   :  { %v1085_v21 = vmax.f32 %v943_v19, 0.0  ;;  %v1371_v22 = vpop.f32.mrb[6].mxu1 }
 0x334   :  { %1118 = vst [vmem:[%s2104_s7 + $0x28] sm:$0xff] %v1086_v20  ;;  %v958_v23 = vadd.f32 %v1371_v22, %v1967_v4  ;;  %v952_v24 = vpop.f32.mrb[7].mxu1 }
 0x335   :  { %1117 = vst [vmem:[%s2104_s7 + $0x20] sm:$0xff] %v1085_v21  ;;  %v953_v25 = vadd.f32 %v1967_v4, %v952_v24 }
 0x336   :  { %v1088_v26 = vmax.f32 %v958_v23, 0.0 }
 0x337   :  { %v1087_v27 = vmax.f32 %v953_v25, 0.0  ;;  %v1374_v28 = vpop.f32.mrb[8].mxu1 }
 0x338   :  { %1120 = vst [vmem:[%s2104_s7 + $0x38] sm:$0xff] %v1088_v26  ;;  %v968_v29 = vadd.f32 %v1374_v28, %v1967_v4  ;;  %v962_v30 = vpop.f32.mrb[9].mxu1 }
 0x339   :  { %1119 = vst [vmem:[%s2104_s7 + $0x30] sm:$0xff] %v1087_v27  ;;  %v963_v31 = vadd.f32 %v1967_v4, %v962_v30 }
 0x33a   :  { %v1090_v32 = vmax.f32 %v968_v29, 0.0 }
 0x33b   :  { %v1089_v33 = vmax.f32 %v963_v31, 0.0  ;;  %v1377_v35 = vpop.f32.mrb[10].mxu1 }
 0x33c   :  { %1122 = vst [vmem:[%s2104_s7 + $0x48] sm:$0xff] %v1090_v32  ;;  %v978_v36 = vadd.f32 %v1377_v35, %v1967_v4  ;;  %v972_v37 = vpop.f32.mrb[11].mxu1 }
 0x33d   :  { %1121 = vst [vmem:[%s2104_s7 + $0x40] sm:$0xff] %v1089_v33  ;;  %v973_v38 = vadd.f32 %v1967_v4, %v972_v37 }
 0x33e   :  { %v1092_v39 = vmax.f32 %v978_v36, 0.0 }
 0x33f   :  { %v1091_v40 = vmax.f32 %v973_v38, 0.0  ;;  %v1380_v41 = vpop.f32.mrb[12].mxu1 }
 0x340   :  { %1124 = vst [vmem:[%s2104_s7 + $0x58] sm:$0xff] %v1092_v39  ;;  %v988_v42 = vadd.f32 %v1380_v41, %v1967_v4  ;;  %v982_v43 = vpop.f32.mrb[13].mxu1 }
 0x341   :  { %1123 = vst [vmem:[%s2104_s7 + $0x50] sm:$0xff] %v1091_v40  ;;  %v983_v44 = vadd.f32 %v1967_v4, %v982_v43 }
 0x342   :  { %v1094_v45 = vmax.f32 %v988_v42, 0.0 }
 0x343   :  { %v1093_v46 = vmax.f32 %v983_v44, 0.0  ;;  %v1383_v47 = vpop.f32.mrb[14].mxu1 }
 0x344   :  { %1126 = vst [vmem:[%s2104_s7 + $0x68] sm:$0xff] %v1094_v45  ;;  %v998_v48 = vadd.f32 %v1383_v47, %v1967_v4  ;;  %v992_v49 = vpop.f32.mrb[15].mxu1 }
 0x345   :  { %1125 = vst [vmem:[%s2104_s7 + $0x60] sm:$0xff] %v1093_v46  ;;  %v993_v50 = vadd.f32 %v1967_v4, %v992_v49 }
 0x346   :  { %v1096_v51 = vmax.f32 %v998_v48, 0.0 }
 0x347   :  { %v1095_v52 = vmax.f32 %v993_v50, 0.0  ;;  %v1386_v53 = vpop.f32.mrb[16].mxu1 }
 0x348   :  { %1128 = vst [vmem:[%s2104_s7 + $0x78] sm:$0xff] %v1096_v51  ;;  %v1008_v54 = vadd.f32 %v1386_v53, %v1967_v4  ;;  %v1002_v55 = vpop.f32.mrb[17].mxu1 }
 0x349   :  { %1127 = vst [vmem:[%s2104_s7 + $0x70] sm:$0xff] %v1095_v52  ;;  %v1003_v56 = vadd.f32 %v1967_v4, %v1002_v55 }
 0x34a   :  { %v1098_v57 = vmax.f32 %v1008_v54, 0.0 }
 0x34b   :  { %v1097_v58 = vmax.f32 %v1003_v56, 0.0  ;;  %v1389_v59 = vpop.f32.mrb[18].mxu1 }
 0x34c   :  { %1130 = vst [vmem:[%s2104_s7 + $0x88] sm:$0xff] %v1098_v57  ;;  %v1018_v60 = vadd.f32 %v1389_v59, %v1967_v4  ;;  %v1012_v61 = vpop.f32.mrb[19].mxu1 }
 0x34d   :  { %1129 = vst [vmem:[%s2104_s7 + $0x80] sm:$0xff] %v1097_v58  ;;  %v1013_v62 = vadd.f32 %v1967_v4, %v1012_v61 }
 0x34e   :  { %v1100_v63 = vmax.f32 %v1018_v60, 0.0 }
 0x34f   :  { %v1099_v0 = vmax.f32 %v1013_v62, 0.0  ;;  %v1392_v1 = vpop.f32.mrb[20].mxu1 }
 0x350   :  { %1132 = vst [vmem:[%s2104_s7 + $0x98] sm:$0xff] %v1100_v63  ;;  %v1028_v2 = vadd.f32 %v1392_v1, %v1967_v4  ;;  %v1022_v3 = vpop.f32.mrb[21].mxu1 }
 0x351   :  { %1131 = vst [vmem:[%s2104_s7 + $0x90] sm:$0xff] %v1099_v0  ;;  %v1023_v5 = vadd.f32 %v1967_v4, %v1022_v3 }
 0x352   :  { %v1102_v6 = vmax.f32 %v1028_v2, 0.0 }
 0x353   :  { %v1101_v7 = vmax.f32 %v1023_v5, 0.0  ;;  %v1395_v8 = vpop.f32.mrb[22].mxu1 }
 0x354   :  { %1134 = vst [vmem:[%s2104_s7 + $0xa8] sm:$0xff] %v1102_v6  ;;  %v1038_v9 = vadd.f32 %v1395_v8, %v1967_v4  ;;  %v1032_v10 = vpop.f32.mrb[23].mxu1 }
 0x355   :  { %1133 = vst [vmem:[%s2104_s7 + $0xa0] sm:$0xff] %v1101_v7  ;;  %v1033_v34 = vadd.f32 %v1967_v4, %v1032_v10 }
 0x356   :  { %v1104_v11 = vmax.f32 %v1038_v9, 0.0 }
 0x357   :  { %v1103_v12 = vmax.f32 %v1033_v34, 0.0  ;;  %v1398_v13 = vpop.f32.mrb[24].mxu1 }
 0x358   :  { %1136 = vst [vmem:[%s2104_s7 + $0xb8] sm:$0xff] %v1104_v11  ;;  %v1048_v14 = vadd.f32 %v1398_v13, %v1967_v4  ;;  %v1042_v15 = vpop.f32.mrb[25].mxu1 }
 0x359   :  { %1135 = vst [vmem:[%s2104_s7 + $0xb0] sm:$0xff] %v1103_v12  ;;  %v1043_v16 = vadd.f32 %v1967_v4, %v1042_v15 }
 0x35a   :  { %v1106_v17 = vmax.f32 %v1048_v14, 0.0 }
 0x35b   :  { %v1105_v18 = vmax.f32 %v1043_v16, 0.0  ;;  %v1401_v19 = vpop.f32.mrb[26].mxu1 }
 0x35c   :  { %1138 = vst [vmem:[%s2104_s7 + $0xc8] sm:$0xff] %v1106_v17  ;;  %v1058_v20 = vadd.f32 %v1401_v19, %v1967_v4  ;;  %v1052_v21 = vpop.f32.mrb[27].mxu1 }
 0x35d   :  { %1137 = vst [vmem:[%s2104_s7 + $0xc0] sm:$0xff] %v1105_v18  ;;  %v1053_v22 = vadd.f32 %v1967_v4, %v1052_v21 }
 0x35e   :  { %v1108_v23 = vmax.f32 %v1058_v20, 0.0 }
 0x35f   :  { %v1107_v24 = vmax.f32 %v1053_v22, 0.0  ;;  %v1404_v25 = vpop.f32.mrb[28].mxu1 }
 0x360   :  { %1140 = vst [vmem:[%s2104_s7 + $0xd8] sm:$0xff] %v1108_v23  ;;  %v1068_v26 = vadd.f32 %v1404_v25, %v1967_v4  ;;  %v1062_v27 = vpop.f32.mrb[29].mxu1 }
 0x361   :  { %1139 = vst [vmem:[%s2104_s7 + $0xd0] sm:$0xff] %v1107_v24  ;;  %v1063_v28 = vadd.f32 %v1967_v4, %v1062_v27 }
 0x362   :  { %v1110_v29 = vmax.f32 %v1068_v26, 0.0 }
 0x363   :  { %v1109_v30 = vmax.f32 %v1063_v28, 0.0  ;;  %v1407_v31 = vpop.f32.mrb[30].mxu1 }
 0x364   :  { %1142 = vst [vmem:[%s2104_s7 + $0xe8] sm:$0xff] %v1110_v29  ;;  %v1078_v32 = vadd.f32 %v1407_v31, %v1967_v4  ;;  %v1072_v33 = vpop.f32.mrb[31].mxu1 }
 0x365   :  { %1141 = vst [vmem:[%s2104_s7 + $0xe0] sm:$0xff] %v1109_v30  ;;  %v1073_v35 = vadd.f32 %v1967_v4, %v1072_v33 }
 0x366   :  { %v1112_v36 = vmax.f32 %v1078_v32, 0.0 }
 0x367   :  { %v1111_v37 = vmax.f32 %v1073_v35, 0.0 }
 0x368   :  { %1144 = vst [vmem:[%s2104_s7 + $0xf8] sm:$0xff] %v1112_v36 }
 0x369   :  { %1143 = vst [vmem:[%s2104_s7 + $0xf0] sm:$0xff] %v1111_v37 }

</bundles_post_ra>
